<compile_context>
chip_gen: v6e
topology: v6e:2x2x1
jax: 0.10.0
libtpu: 0.0.40
codegen_flags: <defaults>
</compile_context>

<pallas_src>
import functools

import jax
import jax.numpy as jnp
from jax.experimental import pallas as pl
from jax.experimental.pallas import tpu as pltpu

LN_EPS = 1e-5  # torch.nn.LayerNorm default


def _round_up(x, m):
    return ((x + m - 1) // m) * m


def _default_tm():
    """128 on v5e (smaller MXU, 1 vst slot), 256 on v6e/v7x."""
    try:
        kind = jax.devices()[0].device_kind.lower()
        if "v5 lite" in kind or "v5e" in kind or "v5lite" in kind:
            return 128
    except Exception:
        pass
    return 256


def _nbytes(shape, dtype):
    n = 1
    for s in shape:
        n *= s
    return n * jnp.dtype(dtype).itemsize


def _const_spec(shape):
    """Grid-invariant block: single buffer (index never changes, so a second
    buffer would never prefetch anything useful — it only doubles VMEM use)."""
    try:
        return pl.BlockSpec(shape, lambda i: (0, 0), pipeline_mode=pl.Buffered(1))
    except TypeError:  # older jax without pipeline_mode on BlockSpec
        return pl.BlockSpec(shape, lambda i: (0, 0))


def _to_clip_mlp_kernel(x_ref, w1_ref, b1_ref, g1_ref, be1_ref,
                        w2_ref, b2_ref, g2_ref, be2_ref, o_ref,
                        *, hidden_real, d_out_real):
    # x_ref: (tm, d_in_p)   w1_ref: (d_in_p, hid_p)   w2_ref: (hid_p, d_out_p)
    hid_p = w1_ref.shape[1]
    d_out_p = w2_ref.shape[1]

    xv = x_ref[...]
    if xv.dtype != w1_ref.dtype:        # keep MXU on the weights' native path
        xv = xv.astype(w1_ref.dtype)

    # --- fc1 (MXU, fp32 accumulation) ---
    h = jnp.dot(xv, w1_ref[...], preferred_element_type=jnp.float32)
    h = h + b1_ref[...]                                    # (tm, hid_p), fp32

    # --- layer_norm1 (two-pass, fp32; padded hidden columns are exactly 0,
    #     so their contribution to the second pass is n_pad * mu^2) ---
    inv_n1 = 1.0 / hidden_real
    mu1 = jnp.sum(h, axis=-1, keepdims=True) * inv_n1
    d1 = h - mu1
    q1 = jnp.sum(d1 * d1, axis=-1, keepdims=True)
    if hid_p != hidden_real:
        q1 = q1 - float(hid_p - hidden_real) * (mu1 * mu1)
    h = d1 * jax.lax.rsqrt(q1 * inv_n1 + LN_EPS)
    h = h * g1_ref[...] + be1_ref[...]      # padded cols -> 0 (gamma/beta zero-padded)

    # --- relu ---
    h = jnp.maximum(h, 0.0)

    # --- fc2 ---
    if h.dtype != w2_ref.dtype:
        h = h.astype(w2_ref.dtype)
    y = jnp.dot(h, w2_ref[...], preferred_element_type=jnp.float32)
    y = y + b2_ref[...]                                    # (tm, d_out_p), fp32

    # --- layer_norm2 over the REAL d_out (same zero-padding argument) ---
    inv_n2 = 1.0 / d_out_real
    mu2 = jnp.sum(y, axis=-1, keepdims=True) * inv_n2
    d2 = y - mu2
    q2 = jnp.sum(d2 * d2, axis=-1, keepdims=True)
    if d_out_p != d_out_real:
        q2 = q2 - float(d_out_p - d_out_real) * (mu2 * mu2)
    y = d2 * jax.lax.rsqrt(q2 * inv_n2 + LN_EPS)
    y = y * g2_ref[...] + be2_ref[...]

    o_ref[...] = y.astype(o_ref.dtype)


def prepare_params(params, *, mm_dtype=None):
    """Cast + zero-pad weights/params ONCE (hoisted out of the per-call path).

    mm_dtype: dtype for the MXU matmuls.  Pass jnp.bfloat16 to run fp32 models
    on the native-rate bf16 MXU path (fp32 accumulation is kept in-kernel).
    None keeps the weights' own dtype (exact fp32 semantics for fp32 params).
    Returns (prepared_arrays, dims) where dims = (d_in, hidden, d_out).
    """
    w1, b1, g1, be1, w2, b2, g2, be2 = params
    d_in, hidden = w1.shape
    d_out = w2.shape[1]
    if mm_dtype is None:
        mm_dtype = w1.dtype
    d_in_p = _round_up(max(d_in, 1), 128)
    hid_p = _round_up(max(hidden, 1), 128)
    d_out_p = _round_up(max(d_out, 1), 128)
    f32 = jnp.float32

    w1p = w1.astype(mm_dtype)
    if (d_in_p, hid_p) != (d_in, hidden):
        w1p = jnp.pad(w1p, ((0, d_in_p - d_in), (0, hid_p - hidden)))
    w2p = w2.astype(mm_dtype)
    if (hid_p, d_out_p) != (hidden, d_out):
        w2p = jnp.pad(w2p, ((0, hid_p - hidden), (0, d_out_p - d_out)))

    def row(v, n_p):
        v = v.astype(f32)
        if v.shape[0] != n_p:
            v = jnp.pad(v, (0, n_p - v.shape[0]))
        return v.reshape(1, n_p)

    prepared = (w1p, row(b1, hid_p), row(g1, hid_p), row(be1, hid_p),
                w2p, row(b2, d_out_p), row(g2, d_out_p), row(be2, d_out_p))
    return prepared, (d_in, hidden, d_out)


@functools.partial(jax.jit, static_argnames=("dims", "tm"))
def to_clip_mlp_prepared(x, prepared, *, dims, tm=None):
    """x: [..., input_dim] -> [..., output_dim], using pre-padded/cast params."""
    d_in, hidden, d_out = dims
    w1p, b1r, g1r, be1r, w2p, b2r, g2r, be2r = prepared
    d_in_p, hid_p = w1p.shape
    d_out_p = w2p.shape[1]
    mm_dtype = w1p.dtype

    lead = x.shape[:-1]
    m = 1
    for s in lead:
        m *= s

    if tm is None:
        tm = _default_tm()
    tm_eff = min(tm, _round_up(max(m, 1), 8))
    m_p = _round_up(max(m, 1), tm_eff)
    # v7x megacore: a single-step "parallel" grid leaves one TensorCore idle.
    if m_p // tm_eff < 2 and m > 8:
        tm_eff = _round_up((m + 1) // 2, 8)
        m_p = _round_up(m, tm_eff)

    # --- VMEM budget: x/out tiles double-buffered, weights/params single-
    #     buffered (pl.Buffered(1)), fp32 intermediates, plus margin ---
    try:
        vmem_cap = int(pltpu.get_tpu_info().vmem_capacity_bytes)
    except Exception:
        vmem_cap = 64 * 1024 * 1024            # conservative (v7x per-TC)

    f32 = jnp.float32

    def footprint(tm_):
        fp = 2 * _nbytes((tm_, d_in_p), x.dtype)          # x tile (double-buffered)
        fp += 2 * _nbytes((tm_, d_out_p), x.dtype)        # out tile (double-buffered)
        fp += _nbytes((d_in_p, hid_p), mm_dtype)          # W1 (single buffer)
        fp += _nbytes((hid_p, d_out_p), mm_dtype)         # W2 (single buffer)
        fp += 3 * _nbytes((1, hid_p), f32) + 3 * _nbytes((1, d_out_p), f32)
        fp += 3 * _nbytes((tm_, hid_p), f32) + 2 * _nbytes((tm_, d_out_p), f32)
        return fp

    # Shrink the row tile until the resident footprint fits comfortably.
    while footprint(tm_eff) > int(0.85 * vmem_cap) and tm_eff > 8:
        tm_eff = max(8, _round_up(tm_eff // 2, 8))
        m_p = _round_up(max(m, 1), tm_eff)
    # TODO(synk): if the (already single-buffered) weights alone exceed VMEM
    # (huge hidden + fp32), stream W2 over the hidden axis with
    # pltpu.emit_pipeline instead of keeping it resident.

    vmem_limit = int(min(max(int(footprint(tm_eff) * 1.3), 32 * 1024 * 1024),
                         vmem_cap))

    # --- pad x only when needed (shapes are static under jit) ---
    x2 = x.reshape(m, d_in)
    if m_p != m or d_in_p != d_in:
        x2 = jnp.pad(x2, ((0, m_p - m), (0, d_in_p - d_in)))

    cost = pl.CostEstimate(
        flops=2 * m_p * hid_p * (d_in_p + d_out_p),
        transcendentals=2 * m_p,
        bytes_accessed=(_nbytes((m_p, d_in_p), x.dtype)
                        + _nbytes((d_in_p, hid_p), mm_dtype)
                        + _nbytes((hid_p, d_out_p), mm_dtype)
                        + 3 * _nbytes((1, hid_p), f32)
                        + 3 * _nbytes((1, d_out_p), f32)
                        + _nbytes((m_p, d_out_p), x.dtype)))

    kernel = functools.partial(_to_clip_mlp_kernel,
                               hidden_real=hidden, d_out_real=d_out)

    out = pl.pallas_call(
        kernel,
        out_shape=jax.ShapeDtypeStruct((m_p, d_out_p), x.dtype),
        grid_spec=pltpu.PrefetchScalarGridSpec(
            num_scalar_prefetch=0,
            grid=(m_p // tm_eff,),
            in_specs=[
                # x row tile (default double buffering; consider pl.Buffered(3)
                # on v5e only if a profile shows exposed DMA).
                pl.BlockSpec((tm_eff, d_in_p), lambda i: (i, 0)),
                _const_spec((d_in_p, hid_p)),     # W1   (resident, 1 buffer)
                _const_spec((1, hid_p)),          # b1
                _const_spec((1, hid_p)),          # gamma1
                _const_spec((1, hid_p)),          # beta1
                _const_spec((hid_p, d_out_p)),    # W2   (resident, 1 buffer)
                _const_spec((1, d_out_p)),        # b2
                _const_spec((1, d_out_p)),        # gamma2
                _const_spec((1, d_out_p)),        # beta2
            ],
            out_specs=pl.BlockSpec((tm_eff, d_out_p), lambda i: (i, 0)),
        ),
        compiler_params=pltpu.CompilerParams(
            dimension_semantics=("parallel",),
            vmem_limit_bytes=vmem_limit),
        cost_estimate=cost,
    )(x2, w1p, b1r, g1r, be1r, w2p, b2r, g2r, be2r)

    # --- slice only when needed ---
    if m_p != m or d_out_p != d_out:
        out = out[:m, :d_out]
    return out.reshape(*lead, d_out)


def to_clip_mlp(x, params, *, tm=None, mm_dtype=None):
    """Convenience wrapper (re-casts/pads weights per call).  For repeated
    calls, hoist prepare_params() once and call to_clip_mlp_prepared."""
    prepared, dims = prepare_params(params, mm_dtype=mm_dtype)
    return to_clip_mlp_prepared(x, prepared, dims=dims, tm=tm)


def init_params(key, input_dim, output_dim, hidden=2048, dtype=jnp.float32):
    """Deterministic init matching nn.Linear / nn.LayerNorm default schemes."""
    k1, k2, k3, k4 = jax.random.split(key, 4)
    bound1 = 1.0 / (input_dim ** 0.5)
    bound2 = 1.0 / (hidden ** 0.5)
    w1 = jax.random.uniform(k1, (input_dim, hidden), dtype, -bound1, bound1)
    b1 = jax.random.uniform(k2, (hidden,), dtype, -bound1, bound1)
    w2 = jax.random.uniform(k3, (hidden, output_dim), dtype, -bound2, bound2)
    b2 = jax.random.uniform(k4, (output_dim,), dtype, -bound2, bound2)
    g1 = jnp.ones((hidden,), dtype)
    be1 = jnp.zeros((hidden,), dtype)
    g2 = jnp.ones((output_dim,), dtype)
    be2 = jnp.zeros((output_dim,), dtype)
    return (w1, b1, g1, be1, w2, b2, g2, be2)


def _reference(x, params):
    """Pure-JAX reference mirroring the PyTorch forward."""
    w1, b1, g1, be1, w2, b2, g2, be2 = params
    h = x @ w1 + b1
    mu = h.mean(-1, keepdims=True)
    var = ((h - mu) ** 2).mean(-1, keepdims=True)
    h = (h - mu) / jnp.sqrt(var + LN_EPS) * g1 + be1
    h = jnp.maximum(h, 0.0)
    y = h @ w2 + b2
    mu2 = y.mean(-1, keepdims=True)
    var2 = ((y - mu2) ** 2).mean(-1, keepdims=True)
    return (y - mu2) / jnp.sqrt(var2 + LN_EPS) * g2 + be2


if __name__ == "__main__":
    batch, seq, input_dim, output_dim = 2, 8, 32, 64

    key = jax.random.PRNGKey(0)
    kx, kp = jax.random.split(key)
    x = jax.random.normal(kx, (batch, seq, input_dim), dtype=jnp.float32)
    params = init_params(kp, input_dim, output_dim)
    ref = _reference(x, params)

    # --- exact fp32 path (weights kept fp32) ---
    prepared_f32, dims = prepare_params(params)            # hoisted, one-time
    out = to_clip_mlp_prepared(x, prepared_f32, dims=dims)
    out = jax.block_until_ready(out)
    assert out.shape == (batch, seq, output_dim)
    assert jnp.allclose(out, ref, atol=5e-4, rtol=5e-4), \
        float(jnp.max(jnp.abs(out - ref)))

    # --- bf16-MXU path (native-rate matmuls, fp32 accumulation) ---
    prepared_bf16, dims_b = prepare_params(params, mm_dtype=jnp.bfloat16)
    out_b = to_clip_mlp_prepared(x, prepared_bf16, dims=dims_b)
    out_b = jax.block_until_ready(out_b)
    assert out_b.shape == (batch, seq, output_dim)
    assert jnp.allclose(out_b, ref, atol=5e-2, rtol=5e-2), \
        float(jnp.max(jnp.abs(out_b - ref)))

    print("KERNEL_OK")
</pallas_src>

<mosaic_0001>
module attributes {stable_mosaic.version = 11 : i64} {
  func.func @_to_clip_mlp_kernel(%arg0: i32, %arg1: memref<8x128xf32, #tpu.memory_space<vmem>>, %arg2: memref<128x2048xf32, #tpu.memory_space<vmem>>, %arg3: memref<1x2048xf32, #tpu.memory_space<vmem>>, %arg4: memref<1x2048xf32, #tpu.memory_space<vmem>>, %arg5: memref<1x2048xf32, #tpu.memory_space<vmem>>, %arg6: memref<2048x128xf32, #tpu.memory_space<vmem>>, %arg7: memref<1x128xf32, #tpu.memory_space<vmem>>, %arg8: memref<1x128xf32, #tpu.memory_space<vmem>>, %arg9: memref<1x128xf32, #tpu.memory_space<vmem>>, %arg10: memref<8x128xf32, #tpu.memory_space<vmem>>) attributes {dimension_semantics = [#tpu.dimension_semantics<parallel>], iteration_bounds = array<i64: 2>, scalar_prefetch = 0 : i64, scratch_operands = 0 : i64, tpu.core_type = #tpu.core_type<tc>, window_params = [{transform_indices = @transform_0, window_bounds = array<i64: 8, 128>}, {pipeline_mode = #tpu.pipeline_mode<synchronous>, transform_indices = @transform_1, window_bounds = array<i64: 128, 2048>}, {pipeline_mode = #tpu.pipeline_mode<synchronous>, transform_indices = @transform_2, window_bounds = array<i64: 1, 2048>}, {pipeline_mode = #tpu.pipeline_mode<synchronous>, transform_indices = @transform_3, window_bounds = array<i64: 1, 2048>}, {pipeline_mode = #tpu.pipeline_mode<synchronous>, transform_indices = @transform_4, window_bounds = array<i64: 1, 2048>}, {pipeline_mode = #tpu.pipeline_mode<synchronous>, transform_indices = @transform_5, window_bounds = array<i64: 2048, 128>}, {pipeline_mode = #tpu.pipeline_mode<synchronous>, transform_indices = @transform_6, window_bounds = array<i64: 1, 128>}, {pipeline_mode = #tpu.pipeline_mode<synchronous>, transform_indices = @transform_7, window_bounds = array<i64: 1, 128>}, {pipeline_mode = #tpu.pipeline_mode<synchronous>, transform_indices = @transform_8, window_bounds = array<i64: 1, 128>}, {transform_indices = @transform_9, window_bounds = array<i64: 8, 128>}]} {
    %c0 = arith.constant 0 : index
    %c0_0 = arith.constant 0 : index
    %0 = vector.load %arg1[%c0, %c0_0] : memref<8x128xf32, #tpu.memory_space<vmem>>, vector<8x128xf32>
    %c0_1 = arith.constant 0 : index
    %c0_2 = arith.constant 0 : index
    %1 = vector.load %arg2[%c0_1, %c0_2] : memref<128x2048xf32, #tpu.memory_space<vmem>>, vector<128x2048xf32>
    %cst = arith.constant dense<0.000000e+00> : vector<8x2048xf32>
    %2 = tpu.matmul %0, %1, %cst {dimension_numbers = #tpu.dot_dimension_numbers<[1], [0], [0], [1], [0, 0, 1, 1], [], []>} : vector<8x128xf32>, vector<128x2048xf32>, vector<8x2048xf32> -> vector<8x2048xf32>
    %c0_3 = arith.constant 0 : index
    %c0_4 = arith.constant 0 : index
    %3 = vector.load %arg3[%c0_3, %c0_4] : memref<1x2048xf32, #tpu.memory_space<vmem>>, vector<1x2048xf32>
    %4 = vector.broadcast %3 : vector<1x2048xf32> to vector<8x2048xf32>
    %5 = arith.addf %2, %4 : vector<8x2048xf32>
    %cst_5 = arith.constant dense<0.000000e+00> : vector<8xf32>
    %6 = vector.multi_reduction <add>, %5, %cst_5 [1] : vector<8x2048xf32> to vector<8xf32>
    %7 = vector.shape_cast %6 : vector<8xf32> to vector<8x1xf32>
    %cst_6 = arith.constant 4.8828125E-4 : f32
    %8 = vector.broadcast %cst_6 : f32 to vector<8x1xf32>
    %9 = arith.mulf %7, %8 : vector<8x1xf32>
    %10 = vector.broadcast %9 : vector<8x1xf32> to vector<8x2048xf32>
    %11 = arith.subf %5, %10 : vector<8x2048xf32>
    %12 = arith.mulf %11, %11 : vector<8x2048xf32>
    %cst_7 = arith.constant dense<0.000000e+00> : vector<8xf32>
    %13 = vector.multi_reduction <add>, %12, %cst_7 [1] : vector<8x2048xf32> to vector<8xf32>
    %14 = vector.shape_cast %13 : vector<8xf32> to vector<8x1xf32>
    %cst_8 = arith.constant 4.8828125E-4 : f32
    %15 = vector.broadcast %cst_8 : f32 to vector<8x1xf32>
    %16 = arith.mulf %14, %15 : vector<8x1xf32>
    %cst_9 = arith.constant 9.99999974E-6 : f32
    %17 = vector.broadcast %cst_9 : f32 to vector<8x1xf32>
    %18 = arith.addf %16, %17 : vector<8x1xf32>
    %19 = math.rsqrt %18 : vector<8x1xf32>
    %20 = vector.broadcast %19 : vector<8x1xf32> to vector<8x2048xf32>
    %21 = arith.mulf %11, %20 : vector<8x2048xf32>
    %c0_10 = arith.constant 0 : index
    %c0_11 = arith.constant 0 : index
    %22 = vector.load %arg4[%c0_10, %c0_11] : memref<1x2048xf32, #tpu.memory_space<vmem>>, vector<1x2048xf32>
    %23 = vector.broadcast %22 : vector<1x2048xf32> to vector<8x2048xf32>
    %24 = arith.mulf %21, %23 : vector<8x2048xf32>
    %c0_12 = arith.constant 0 : index
    %c0_13 = arith.constant 0 : index
    %25 = vector.load %arg5[%c0_12, %c0_13] : memref<1x2048xf32, #tpu.memory_space<vmem>>, vector<1x2048xf32>
    %26 = vector.broadcast %25 : vector<1x2048xf32> to vector<8x2048xf32>
    %27 = arith.addf %24, %26 : vector<8x2048xf32>
    %cst_14 = arith.constant 0.000000e+00 : f32
    %28 = vector.broadcast %cst_14 : f32 to vector<8x2048xf32>
    %29 = arith.maximumf %27, %28 : vector<8x2048xf32>
    %c0_15 = arith.constant 0 : index
    %c0_16 = arith.constant 0 : index
    %30 = vector.load %arg6[%c0_15, %c0_16] : memref<2048x128xf32, #tpu.memory_space<vmem>>, vector<2048x128xf32>
    %cst_17 = arith.constant dense<0.000000e+00> : vector<8x128xf32>
    %31 = tpu.matmul %29, %30, %cst_17 {dimension_numbers = #tpu.dot_dimension_numbers<[1], [0], [0], [1], [0, 0, 1, 1], [], []>} : vector<8x2048xf32>, vector<2048x128xf32>, vector<8x128xf32> -> vector<8x128xf32>
    %c0_18 = arith.constant 0 : index
    %c0_19 = arith.constant 0 : index
    %32 = vector.load %arg7[%c0_18, %c0_19] : memref<1x128xf32, #tpu.memory_space<vmem>>, vector<1x128xf32>
    %33 = vector.broadcast %32 : vector<1x128xf32> to vector<8x128xf32>
    %34 = arith.addf %31, %33 : vector<8x128xf32>
    %cst_20 = arith.constant dense<0.000000e+00> : vector<8xf32>
    %35 = vector.multi_reduction <add>, %34, %cst_20 [1] : vector<8x128xf32> to vector<8xf32>
    %36 = vector.shape_cast %35 : vector<8xf32> to vector<8x1xf32>
    %cst_21 = arith.constant 1.562500e-02 : f32
    %37 = vector.broadcast %cst_21 : f32 to vector<8x1xf32>
    %38 = arith.mulf %36, %37 : vector<8x1xf32>
    %39 = vector.broadcast %38 : vector<8x1xf32> to vector<8x128xf32>
    %40 = arith.subf %34, %39 : vector<8x128xf32>
    %41 = arith.mulf %40, %40 : vector<8x128xf32>
    %cst_22 = arith.constant dense<0.000000e+00> : vector<8xf32>
    %42 = vector.multi_reduction <add>, %41, %cst_22 [1] : vector<8x128xf32> to vector<8xf32>
    %43 = vector.shape_cast %42 : vector<8xf32> to vector<8x1xf32>
    %44 = arith.mulf %38, %38 : vector<8x1xf32>
    %cst_23 = arith.constant 6.400000e+01 : f32
    %45 = vector.broadcast %cst_23 : f32 to vector<8x1xf32>
    %46 = arith.mulf %45, %44 : vector<8x1xf32>
    %47 = arith.subf %43, %46 : vector<8x1xf32>
    %cst_24 = arith.constant 1.562500e-02 : f32
    %48 = vector.broadcast %cst_24 : f32 to vector<8x1xf32>
    %49 = arith.mulf %47, %48 : vector<8x1xf32>
    %cst_25 = arith.constant 9.99999974E-6 : f32
    %50 = vector.broadcast %cst_25 : f32 to vector<8x1xf32>
    %51 = arith.addf %49, %50 : vector<8x1xf32>
    %52 = math.rsqrt %51 : vector<8x1xf32>
    %53 = vector.broadcast %52 : vector<8x1xf32> to vector<8x128xf32>
    %54 = arith.mulf %40, %53 : vector<8x128xf32>
    %c0_26 = arith.constant 0 : index
    %c0_27 = arith.constant 0 : index
    %55 = vector.load %arg8[%c0_26, %c0_27] : memref<1x128xf32, #tpu.memory_space<vmem>>, vector<1x128xf32>
    %56 = vector.broadcast %55 : vector<1x128xf32> to vector<8x128xf32>
    %57 = arith.mulf %54, %56 : vector<8x128xf32>
    %c0_28 = arith.constant 0 : index
    %c0_29 = arith.constant 0 : index
    %58 = vector.load %arg9[%c0_28, %c0_29] : memref<1x128xf32, #tpu.memory_space<vmem>>, vector<1x128xf32>
    %59 = vector.broadcast %58 : vector<1x128xf32> to vector<8x128xf32>
    %60 = arith.addf %57, %59 : vector<8x128xf32>
    %c0_30 = arith.constant 0 : index
    %c0_31 = arith.constant 0 : index
    %61 = vector.load %arg10[%c0_30, %c0_31] : memref<8x128xf32, #tpu.memory_space<vmem>>, vector<8x128xf32>
    tpu.vector_store %arg10[%c0_30, %c0_31], %60 {strides = array<i32>} : memref<8x128xf32, #tpu.memory_space<vmem>>, vector<8x128xf32>,
    return
  }
  func.func @transform_0(%arg0: i32) -> (i32, i32) {
    %c0_i32 = arith.constant 0 : i32
    %c0_i32_0 = arith.constant 0 : i32
    return %arg0, %c0_i32 : i32, i32
  }
  func.func @transform_1(%arg0: i32) -> (i32, i32) {
    %c0_i32 = arith.constant 0 : i32
    %c0_i32_0 = arith.constant 0 : i32
    %c0_i32_1 = arith.constant 0 : i32
    return %c0_i32, %c0_i32_0 : i32, i32
  }
  func.func @transform_2(%arg0: i32) -> (i32, i32) {
    %c0_i32 = arith.constant 0 : i32
    %c0_i32_0 = arith.constant 0 : i32
    %c0_i32_1 = arith.constant 0 : i32
    return %c0_i32, %c0_i32_0 : i32, i32
  }
  func.func @transform_3(%arg0: i32) -> (i32, i32) {
    %c0_i32 = arith.constant 0 : i32
    %c0_i32_0 = arith.constant 0 : i32
    %c0_i32_1 = arith.constant 0 : i32
    return %c0_i32, %c0_i32_0 : i32, i32
  }
  func.func @transform_4(%arg0: i32) -> (i32, i32) {
    %c0_i32 = arith.constant 0 : i32
    %c0_i32_0 = arith.constant 0 : i32
    %c0_i32_1 = arith.constant 0 : i32
    return %c0_i32, %c0_i32_0 : i32, i32
  }
  func.func @transform_5(%arg0: i32) -> (i32, i32) {
    %c0_i32 = arith.constant 0 : i32
    %c0_i32_0 = arith.constant 0 : i32
    %c0_i32_1 = arith.constant 0 : i32
    return %c0_i32, %c0_i32_0 : i32, i32
  }
  func.func @transform_6(%arg0: i32) -> (i32, i32) {
    %c0_i32 = arith.constant 0 : i32
    %c0_i32_0 = arith.constant 0 : i32
    %c0_i32_1 = arith.constant 0 : i32
    return %c0_i32, %c0_i32_0 : i32, i32
  }
  func.func @transform_7(%arg0: i32) -> (i32, i32) {
    %c0_i32 = arith.constant 0 : i32
    %c0_i32_0 = arith.constant 0 : i32
    %c0_i32_1 = arith.constant 0 : i32
    return %c0_i32, %c0_i32_0 : i32, i32
  }
  func.func @transform_8(%arg0: i32) -> (i32, i32) {
    %c0_i32 = arith.constant 0 : i32
    %c0_i32_0 = arith.constant 0 : i32
    %c0_i32_1 = arith.constant 0 : i32
    return %c0_i32, %c0_i32_0 : i32, i32
  }
  func.func @transform_9(%arg0: i32) -> (i32, i32) {
    %c0_i32 = arith.constant 0 : i32
    %c0_i32_0 = arith.constant 0 : i32
    return %arg0, %c0_i32 : i32, i32
  }
}

</mosaic_0001>

<bundles_post_ra>
// kernel: to_clip_mlp_prepared.1
= control target key start
LH: loop header
LB: loop body
LE: loop exit
PB: predicated region body
PF: predicated region fallthrough
CT: control target
= control target key end

     0   :  { %14 = vsyncpa [#allocation3], 0  ;;  %s3419_s0 = inlined_call_operand.vmem [shape: f32[16,128], index: 0, kind: input, shape index: {}]   ;;  %s3420_s1 = inlined_call_operand.hbm [shape: f32[128,2048], index: 1, kind: input, shape index: {}]   ;;  %s3421_s2 = inlined_call_operand.vmem [shape: f32[1,2048], index: 2, kind: input, shape index: {}]   ;;  %s3422_s3 = inlined_call_operand.vmem [shape: f32[1,2048], index: 3, kind: input, shape index: {}]   ;;  %s3423_s4 = inlined_call_operand.hbm [shape: f32[1,2048], index: 4, kind: input, shape index: {}]   ;;  %s3424_s5 = inlined_call_operand.hbm [shape: f32[2048,128], index: 5, kind: input, shape index: {}]   ;;  %s3425_s6 = inlined_call_operand.vmem [shape: f32[1,128], index: 6, kind: input, shape index: {}]   ;;  %s3426_s7 = inlined_call_operand.vmem [shape: f32[1,128], index: 7, kind: input, shape index: {}]   ;;  %s3427_s8 = inlined_call_operand.vmem [shape: f32[1,128], index: 8, kind: input, shape index: {}]   ;;  %s3428_s9 = inlined_call_operand.vmem [shape: f32[16,128], index: 9, kind: output, shape index: {}]  }
   0x1   :  { %15 = vsyncpa [#allocation5], 0  ;;  %s3015_s30 = smov 0  }
   0x2 LB: > { %s2958_s10 = smov [#allocation4]   ;;  %s3021_s12 = sadd.s32 4294967295, %s2956_s30   ;;  %s2956_s30 = sphi %s3015_s30, %s21_s30  }
   0x3   : > { %s278_s11 = sshll.u32 %s2958_s10, 4  ;;  %p2521_p0 = scmp.ge.s32.totalorder %s2956_s30, 1  ;;  %s279_s11 = int_to_ptr.vmem [resolvable:$true] %s278_s11 }
   0x4   : > { %p246_p1 = scmp.lt.s32.totalorder %s2956_s30, 3  ;;  %p2839_p2 = scmp.eq.s32.totalorder %s3021_s12, 0 }
   0x5   : > { %s2959_s14 = smov [#allocation2]   ;;  %s2960_s17 = smov [#allocation6]  }
   0x6   : > { %p3026_p3 = pnand %p2521_p0, %p246_p1  ;;  %s258_s15 = sshll.u32 %s2959_s14, 4  ;;  %s3032_s15 = int_to_ptr.vmem [resolvable:$true] %s258_s15 }
   0x7   : > { %s288_s18 = sshll.u32 %s2960_s17, 4  ;;  %s2875_s19 = scalar_lea.vmem %s279_s11, 256  ;;  %s3040_s18 = int_to_ptr.vmem [resolvable:$true] %s288_s18 }
   0x8   : > { %p2829_p4 = pneg %p3026_p3  ;;  %p2876_p7 = scmp.ne.s32.totalorder %s279_s11, %s2875_s19 }
   0x9   : > { %p2883_p10 = scmp.lt.s32.totalorder %s279_s11, %s279_s11  ;;  %p2884_p11 = scmp.lt.s32.totalorder %s2875_s19, %s2875_s19 }
   0xa   : > { %p3036_p5 = pnand %p2839_p2, %p2829_p4 }
   0xb   : > { %p2885_p12 = por %p2884_p11, %p2883_p10 }
   0xc   : > { %p2866_p6 = pneg %p3036_p5 }
   0xe   : > { %p2878_p8 = pnand %p2876_p7, %p2866_p6 }
  0x10   : > { %p2879_p9 = pneg %p2878_p8 }
  0x12   : > { %p2886_p13 = pnand %p2885_p12, %p2879_p9 }
  0x14   : > { %2889 = shalt.err (!%p2886_p13)
}
  0x15   : > { %2835 = dma.hbm_to_vmem [thread:$0]  (!%p3036_p5), %s3423_s4, 256, %s279_s11, [#allocation5]  }
  0x16   : > { %s2901_s22 = scalar_lea.vmem %s3032_s15, 32768  ;;  %p2909_p7 = scmp.lt.s32.totalorder %s3032_s15, %s3032_s15 }
  0x17   : > { %p2902_p0 = scmp.ne.s32.totalorder %s3032_s15, %s2901_s22  ;;  %p2910_p8 = scmp.lt.s32.totalorder %s2901_s22, %s2901_s22 }
  0x19   : > { %p2904_p1 = pnand %p2902_p0, %p2866_p6  ;;  %p2911_p9 = por %p2910_p8, %p2909_p7 }
  0x1b   : > { %p2905_p4 = pneg %p2904_p1 }
  0x1d   : > { %p2912_p10 = pnand %p2911_p9, %p2905_p4 }
  0x1f   : > { %2915 = shalt.err (!%p2912_p10)
}
  0x20   : > { %s2961_s23 = smov 2048   ;;  %s2962_s24 = smov 128  }
  0x21   : > { %2832 = dma.hbm_to_vmem [thread:$0]  (!%p3036_p5), %s3420_s1, 32768, %s3032_s15, [#allocation3], %s2961_s23, %s2961_s23, %s2962_s24  }
  0x22   : > { %s2927_s27 = scalar_lea.vmem %s3040_s18, 32768  ;;  %p2935_p0 = scmp.lt.s32.totalorder %s3040_s18, %s3040_s18 }
  0x23   : > { %p2928_p11 = scmp.ne.s32.totalorder %s3040_s18, %s2927_s27  ;;  %p2936_p1 = scmp.lt.s32.totalorder %s2927_s27, %s2927_s27 }
  0x25   : > { %p2930_p12 = pnand %p2928_p11, %p2866_p6  ;;  %p2937_p4 = por %p2936_p1, %p2935_p0 }
  0x27   : > { %p2931_p13 = pneg %p2930_p12 }
  0x29   : > { %p2938_p7 = pnand %p2937_p4, %p2931_p13 }
  0x2b   : > { %2941 = shalt.err (!%p2938_p7)
}
  0x2c   : > { %s2963_s28 = smov 8   ;;  %320 = sbr.rel (%p3026_p3) target bundleno = 1339 (0x53b), region = 56 }
  0x2d   : > { %2838 = dma.hbm_to_vmem [thread:$0]  (!%p3036_p5), %s3424_s5, 32768, %s3040_s18, [#allocation5], %s2962_s24, %s2962_s24, %s2963_s28  }
  0x31   : > { %2947 = dma.done.wait (%p2839_p2), [#allocation3], 32768  }
  0x32   : > { %2949 = vsyncadd (%p2839_p2), [#allocation3], 4294934528 }
  0x33   : > { %2951 = dma.done.wait (%p2839_p2), [#allocation5], 33024  }
  0x34   : > { %2953 = vsyncadd (%p2839_p2), [#allocation5], 4294934272  ;;  %v2964_v0 = vmov 0.0   ;;  %v612_v1 = vld [vmem:[#allocation2 + $0x788] sm:$0xff]  ;;  %v611_v2 = vld [vmem:[#allocation2 + $0x780] sm:$0xff]  ;;  %p362_p2 = scmp.lt.s32.totalorder %s3021_s12, 1 }
  0x35   : > { %775 = vmatprep.mubr.f32.mxu0 %v2964_v0  ;;  %846 = vmatprep.mubr.f32.mxu1 %v2964_v0  ;;  %v596_v3 = vld [vmem:[#allocation2 + $0x708] sm:$0xff]  ;;  %v614_v4 = vld [vmem:[#allocation2 + $0x798] sm:$0xff]  ;;  %v595_v5 = vld [vmem:[#allocation2 + $0x700] sm:$0xff] }
  0x36   : > { %711 = vmatprep.subr.mxu0 %v612_v1  ;;  %v613_v6 = vld [vmem:[#allocation2 + $0x790] sm:$0xff]  ;;  %782 = vmatprep.subr.mxu1 %v614_v4  ;;  %v580_v7 = vld [vmem:[#allocation2 + $0x688] sm:$0xff]  ;;  %v598_v8 = vld [vmem:[#allocation2 + $0x718] sm:$0xff]  ;;  %s3432_s12 = smov (!%p362_p2, %s3021_s12), 1 }
  0x37   : > { %712 = vmatpush1.msra.mxu0 %v611_v2  ;;  %783 = vmatpush1.msra.mxu1 %v613_v6  ;;  %v579_v9 = vld [vmem:[#allocation2 + $0x680] sm:$0xff]  ;;  %v597_v10 = vld [vmem:[#allocation2 + $0x710] sm:$0xff]  ;;  %v582_v11 = vld [vmem:[#allocation2 + $0x698] sm:$0xff]  ;;  %s2530_s11 = sshll.u32 %s3432_s12, 3 }
  0x38   : > { %713 = vmatprep.subr.mxu0 %v596_v3  ;;  %784 = vmatprep.subr.mxu1 %v598_v8  ;;  %v564_v12 = vld [vmem:[#allocation2 + $0x608] sm:$0xff]  ;;  %v581_v13 = vld [vmem:[#allocation2 + $0x690] sm:$0xff]  ;;  %v563_v14 = vld [vmem:[#allocation2 + $0x600] sm:$0xff]  ;;  %s365_s15 = scalar_lea.vmem %s3419_s0, %s2530_s11  ;;  %s369_s14 = scalar_lea.vmem %s3428_s9, %s2530_s11 }
  0x39   : > { %714 = vmatpush1.msra.mxu0 %v595_v5  ;;  %785 = vmatpush1.msra.mxu1 %v597_v10  ;;  %v566_v15 = vld [vmem:[#allocation2 + $0x618] sm:$0xff]  ;;  %v548_v16 = vld [vmem:[#allocation2 + $0x588] sm:$0xff]  ;;  %v565_v17 = vld [vmem:[#allocation2 + $0x610] sm:$0xff] }
  0x3a   : > { %715 = vmatprep.subr.mxu0 %v580_v7  ;;  %786 = vmatprep.subr.mxu1 %v582_v11  ;;  %v547_v18 = vld [vmem:[#allocation2 + $0x580] sm:$0xff]  ;;  %v550_v19 = vld [vmem:[#allocation2 + $0x598] sm:$0xff]  ;;  %v532_v20 = vld [vmem:[#allocation2 + $0x508] sm:$0xff] }
  0x3b   : > { %716 = vmatpush1.msra.mxu0 %v579_v9  ;;  %787 = vmatpush1.msra.mxu1 %v581_v13  ;;  %v549_v21 = vld [vmem:[#allocation2 + $0x590] sm:$0xff]  ;;  %v531_v22 = vld [vmem:[#allocation2 + $0x500] sm:$0xff]  ;;  %v534_v23 = vld [vmem:[#allocation2 + $0x518] sm:$0xff] }
  0x3c   : > { %717 = vmatprep.subr.mxu0 %v564_v12  ;;  %788 = vmatprep.subr.mxu1 %v566_v15  ;;  %v516_v24 = vld [vmem:[#allocation2 + $0x488] sm:$0xff]  ;;  %v533_v25 = vld [vmem:[#allocation2 + $0x510] sm:$0xff]  ;;  %v515_v26 = vld [vmem:[#allocation2 + $0x480] sm:$0xff] }
  0x3d   : > { %718 = vmatpush1.msra.mxu0 %v563_v14  ;;  %789 = vmatpush1.msra.mxu1 %v565_v17  ;;  %v518_v27 = vld [vmem:[#allocation2 + $0x498] sm:$0xff]  ;;  %v500_v28 = vld [vmem:[#allocation2 + $0x408] sm:$0xff]  ;;  %v517_v29 = vld [vmem:[#allocation2 + $0x490] sm:$0xff] }
  0x3e   : > { %719 = vmatprep.subr.mxu0 %v548_v16  ;;  %790 = vmatprep.subr.mxu1 %v550_v19  ;;  %v499_v30 = vld [vmem:[#allocation2 + $0x400] sm:$0xff]  ;;  %v502_v31 = vld [vmem:[#allocation2 + $0x418] sm:$0xff]  ;;  %v484_v32 = vld [vmem:[#allocation2 + $0x388] sm:$0xff] }
  0x3f   : > { %720 = vmatpush1.msra.mxu0 %v547_v18  ;;  %791 = vmatpush1.msra.mxu1 %v549_v21  ;;  %v501_v33 = vld [vmem:[#allocation2 + $0x410] sm:$0xff]  ;;  %v483_v34 = vld [vmem:[#allocation2 + $0x380] sm:$0xff]  ;;  %v486_v35 = vld [vmem:[#allocation2 + $0x398] sm:$0xff] }
  0x40   : > { %721 = vmatprep.subr.mxu0 %v532_v20  ;;  %792 = vmatprep.subr.mxu1 %v534_v23  ;;  %v468_v36 = vld [vmem:[#allocation2 + $0x308] sm:$0xff]  ;;  %v485_v37 = vld [vmem:[#allocation2 + $0x390] sm:$0xff]  ;;  %v467_v38 = vld [vmem:[#allocation2 + $0x300] sm:$0xff] }
  0x41   : > { %722 = vmatpush1.msra.mxu0 %v531_v22  ;;  %793 = vmatpush1.msra.mxu1 %v533_v25  ;;  %v470_v39 = vld [vmem:[#allocation2 + $0x318] sm:$0xff]  ;;  %v452_v40 = vld [vmem:[#allocation2 + $0x288] sm:$0xff]  ;;  %v469_v41 = vld [vmem:[#allocation2 + $0x310] sm:$0xff] }
  0x42   : > { %723 = vmatprep.subr.mxu0 %v516_v24  ;;  %794 = vmatprep.subr.mxu1 %v518_v27  ;;  %v451_v42 = vld [vmem:[#allocation2 + $0x280] sm:$0xff]  ;;  %v454_v43 = vld [vmem:[#allocation2 + $0x298] sm:$0xff]  ;;  %v436_v44 = vld [vmem:[#allocation2 + $0x208] sm:$0xff] }
  0x43   : > { %724 = vmatpush1.msra.mxu0 %v515_v26  ;;  %795 = vmatpush1.msra.mxu1 %v517_v29  ;;  %v453_v45 = vld [vmem:[#allocation2 + $0x290] sm:$0xff]  ;;  %v435_v46 = vld [vmem:[#allocation2 + $0x200] sm:$0xff]  ;;  %v438_v47 = vld [vmem:[#allocation2 + $0x218] sm:$0xff] }
  0x44   : > { %725 = vmatprep.subr.mxu0 %v500_v28  ;;  %796 = vmatprep.subr.mxu1 %v502_v31  ;;  %v420_v48 = vld [vmem:[#allocation2 + $0x188] sm:$0xff]  ;;  %v437_v49 = vld [vmem:[#allocation2 + $0x210] sm:$0xff]  ;;  %v419_v50 = vld [vmem:[#allocation2 + $0x180] sm:$0xff] }
  0x45   : > { %726 = vmatpush1.msra.mxu0 %v499_v30  ;;  %797 = vmatpush1.msra.mxu1 %v501_v33  ;;  %v422_v51 = vld [vmem:[#allocation2 + $0x198] sm:$0xff]  ;;  %v404_v52 = vld [vmem:[#allocation2 + $0x108] sm:$0xff]  ;;  %v421_v53 = vld [vmem:[#allocation2 + $0x190] sm:$0xff] }
  0x46   : > { %727 = vmatprep.subr.mxu0 %v484_v32  ;;  %798 = vmatprep.subr.mxu1 %v486_v35  ;;  %v403_v54 = vld [vmem:[#allocation2 + $0x100] sm:$0xff]  ;;  %v406_v55 = vld [vmem:[#allocation2 + $0x118] sm:$0xff]  ;;  %v388_v56 = vld [vmem:[#allocation2 + $0x88] sm:$0xff] }
  0x47   : > { %728 = vmatpush1.msra.mxu0 %v483_v34  ;;  %799 = vmatpush1.msra.mxu1 %v485_v37  ;;  %v405_v57 = vld [vmem:[#allocation2 + $0x110] sm:$0xff]  ;;  %v387_v58 = vld [vmem:[#allocation2 + $0x80] sm:$0xff]  ;;  %v390_v59 = vld [vmem:[#allocation2 + $0x98] sm:$0xff] }
  0x48   : > { %729 = vmatprep.subr.mxu0 %v468_v36  ;;  %800 = vmatprep.subr.mxu1 %v470_v39  ;;  %v372_v60 = vld [vmem:[#allocation2 + $0x8] sm:$0xff]  ;;  %v389_v61 = vld [vmem:[#allocation2 + $0x90] sm:$0xff]  ;;  %v371_v62 = vld [vmem:[#allocation2] sm:$0xff] }
  0x49   : > { %730 = vmatpush1.msra.mxu0 %v467_v38  ;;  %801 = vmatpush1.msra.mxu1 %v469_v41  ;;  %v374_v63 = vld [vmem:[#allocation2 + $0x18] sm:$0xff]  ;;  %v3102_v1 = vld [vmem:[%s365_s15] sm:$0xff]  ;;  %v616_v2 = vld [vmem:[#allocation2 + $0x7a8] sm:$0xff] }
  0x4a   : > { %731 = vmatprep.subr.mxu0 %v452_v40  ;;  %802 = vmatprep.subr.mxu1 %v454_v43  ;;  %v373_v3 = vld [vmem:[#allocation2 + $0x10] sm:$0xff]  ;;  %v615_v4 = vld [vmem:[#allocation2 + $0x7a0] sm:$0xff]  ;;  %v600_v5 = vld [vmem:[#allocation2 + $0x728] sm:$0xff] }
  0x4b   : > { %732 = vmatpush1.msra.mxu0 %v451_v42  ;;  %803 = vmatpush1.msra.mxu1 %v453_v45  ;;  %v618_v6 = vld [vmem:[#allocation2 + $0x7b8] sm:$0xff]  ;;  %v599_v7 = vld [vmem:[#allocation2 + $0x720] sm:$0xff]  ;;  %v617_v8 = vld [vmem:[#allocation2 + $0x7b0] sm:$0xff] }
  0x4c   : > { %733 = vmatprep.subr.mxu0 %v436_v44  ;;  %804 = vmatprep.subr.mxu1 %v438_v47  ;;  %v584_v9 = vld [vmem:[#allocation2 + $0x6a8] sm:$0xff]  ;;  %v602_v10 = vld [vmem:[#allocation2 + $0x738] sm:$0xff]  ;;  %v583_v11 = vld [vmem:[#allocation2 + $0x6a0] sm:$0xff] }
  0x4d   : > { %734 = vmatpush1.msra.mxu0 %v435_v46  ;;  %805 = vmatpush1.msra.mxu1 %v437_v49  ;;  %v601_v12 = vld [vmem:[#allocation2 + $0x730] sm:$0xff]  ;;  %v568_v13 = vld [vmem:[#allocation2 + $0x628] sm:$0xff]  ;;  %v586_v14 = vld [vmem:[#allocation2 + $0x6b8] sm:$0xff] }
  0x4e   : > { %735 = vmatprep.subr.mxu0 %v420_v48  ;;  %806 = vmatprep.subr.mxu1 %v422_v51  ;;  %v567_v15 = vld [vmem:[#allocation2 + $0x620] sm:$0xff]  ;;  %v585_v16 = vld [vmem:[#allocation2 + $0x6b0] sm:$0xff]  ;;  %v552_v17 = vld [vmem:[#allocation2 + $0x5a8] sm:$0xff] }
  0x4f   : > { %736 = vmatpush1.msra.mxu0 %v419_v50  ;;  %807 = vmatpush1.msra.mxu1 %v421_v53  ;;  %v570_v18 = vld [vmem:[#allocation2 + $0x638] sm:$0xff]  ;;  %v551_v19 = vld [vmem:[#allocation2 + $0x5a0] sm:$0xff]  ;;  %v569_v20 = vld [vmem:[#allocation2 + $0x630] sm:$0xff] }
  0x50   : > { %737 = vmatprep.subr.mxu0 %v404_v52  ;;  %808 = vmatprep.subr.mxu1 %v406_v55  ;;  %v536_v21 = vld [vmem:[#allocation2 + $0x528] sm:$0xff]  ;;  %v554_v22 = vld [vmem:[#allocation2 + $0x5b8] sm:$0xff]  ;;  %v535_v23 = vld [vmem:[#allocation2 + $0x520] sm:$0xff] }
  0x51   : > { %738 = vmatpush1.msra.mxu0 %v403_v54  ;;  %809 = vmatpush1.msra.mxu1 %v405_v57  ;;  %v553_v24 = vld [vmem:[#allocation2 + $0x5b0] sm:$0xff]  ;;  %v520_v25 = vld [vmem:[#allocation2 + $0x4a8] sm:$0xff]  ;;  %v538_v26 = vld [vmem:[#allocation2 + $0x538] sm:$0xff] }
  0x52   : > { %739 = vmatprep.subr.mxu0 %v388_v56  ;;  %810 = vmatprep.subr.mxu1 %v390_v59  ;;  %v519_v27 = vld [vmem:[#allocation2 + $0x4a0] sm:$0xff]  ;;  %v537_v28 = vld [vmem:[#allocation2 + $0x530] sm:$0xff]  ;;  %v504_v29 = vld [vmem:[#allocation2 + $0x428] sm:$0xff] }
  0x53   : > { %740 = vmatpush1.msra.mxu0 %v387_v58  ;;  %811 = vmatpush1.msra.mxu1 %v389_v61  ;;  %v522_v30 = vld [vmem:[#allocation2 + $0x4b8] sm:$0xff]  ;;  %v503_v31 = vld [vmem:[#allocation2 + $0x420] sm:$0xff]  ;;  %v521_v32 = vld [vmem:[#allocation2 + $0x4b0] sm:$0xff] }
  0x54   : > { %741 = vmatprep.subr.mxu0 %v372_v60  ;;  %812 = vmatprep.subr.mxu1 %v374_v63  ;;  %v488_v33 = vld [vmem:[#allocation2 + $0x3a8] sm:$0xff]  ;;  %v506_v34 = vld [vmem:[#allocation2 + $0x438] sm:$0xff]  ;;  %v487_v35 = vld [vmem:[#allocation2 + $0x3a0] sm:$0xff] }
  0x55   : > { %742 = vmatpush1.msra.mxu0 %v371_v62  ;;  %813 = vmatpush1.msra.mxu1 %v373_v3  ;;  %v505_v36 = vld [vmem:[#allocation2 + $0x430] sm:$0xff]  ;;  %v472_v37 = vld [vmem:[#allocation2 + $0x328] sm:$0xff]  ;;  %v490_v38 = vld [vmem:[#allocation2 + $0x3b8] sm:$0xff] }
  0x56   : > { %776 = vmatmul.mubr.f32.vlgmr.msra.gmra.mxu0 %v3102_v1  ;;  %853 = vmatprep.subr.mxu0 %v616_v2  ;;  %v471_v39 = vld [vmem:[#allocation2 + $0x320] sm:$0xff]  ;;  %v489_v40 = vld [vmem:[#allocation2 + $0x3b0] sm:$0xff]  ;;  %v456_v41 = vld [vmem:[#allocation2 + $0x2a8] sm:$0xff] }
  0x57   : > { %854 = vmatpush1.msra.mxu0 %v615_v4  ;;  %924 = vmatprep.subr.mxu1 %v618_v6  ;;  %v474_v42 = vld [vmem:[#allocation2 + $0x338] sm:$0xff]  ;;  %v455_v43 = vld [vmem:[#allocation2 + $0x2a0] sm:$0xff]  ;;  %v473_v44 = vld [vmem:[#allocation2 + $0x330] sm:$0xff] }
  0x58   : > { %855 = vmatprep.subr.mxu0 %v600_v5  ;;  %847 = vmatmul.mubr.f32.vlgmr.msra.gmra.mxu1 %v3102_v1  ;;  %v440_v45 = vld [vmem:[#allocation2 + $0x228] sm:$0xff]  ;;  %v458_v46 = vld [vmem:[#allocation2 + $0x2b8] sm:$0xff]  ;;  %v439_v47 = vld [vmem:[#allocation2 + $0x220] sm:$0xff] }
  0x59   : > { %856 = vmatpush1.msra.mxu0 %v599_v7  ;;  %925 = vmatpush1.msra.mxu1 %v617_v8  ;;  %v457_v48 = vld [vmem:[#allocation2 + $0x2b0] sm:$0xff]  ;;  %v424_v49 = vld [vmem:[#allocation2 + $0x1a8] sm:$0xff]  ;;  %v442_v50 = vld [vmem:[#allocation2 + $0x238] sm:$0xff] }
  0x5a   : > { %857 = vmatprep.subr.mxu0 %v584_v9  ;;  %926 = vmatprep.subr.mxu1 %v602_v10  ;;  %v423_v51 = vld [vmem:[#allocation2 + $0x1a0] sm:$0xff]  ;;  %v441_v52 = vld [vmem:[#allocation2 + $0x230] sm:$0xff]  ;;  %v408_v53 = vld [vmem:[#allocation2 + $0x128] sm:$0xff] }
  0x5b   : > { %858 = vmatpush1.msra.mxu0 %v583_v11  ;;  %927 = vmatpush1.msra.mxu1 %v601_v12  ;;  %v426_v54 = vld [vmem:[#allocation2 + $0x1b8] sm:$0xff]  ;;  %v407_v55 = vld [vmem:[#allocation2 + $0x120] sm:$0xff]  ;;  %v425_v56 = vld [vmem:[#allocation2 + $0x1b0] sm:$0xff] }
  0x5c   : > { %859 = vmatprep.subr.mxu0 %v568_v13  ;;  %928 = vmatprep.subr.mxu1 %v586_v14  ;;  %v392_v57 = vld [vmem:[#allocation2 + $0xa8] sm:$0xff]  ;;  %v410_v58 = vld [vmem:[#allocation2 + $0x138] sm:$0xff]  ;;  %v391_v59 = vld [vmem:[#allocation2 + $0xa0] sm:$0xff] }
  0x5d   : > { %860 = vmatpush1.msra.mxu0 %v567_v15  ;;  %929 = vmatpush1.msra.mxu1 %v585_v16  ;;  %v409_v60 = vld [vmem:[#allocation2 + $0x130] sm:$0xff]  ;;  %v376_v61 = vld [vmem:[#allocation2 + $0x28] sm:$0xff]  ;;  %v394_v62 = vld [vmem:[#allocation2 + $0xb8] sm:$0xff] }
  0x5e   : > { %861 = vmatprep.subr.mxu0 %v552_v17  ;;  %930 = vmatprep.subr.mxu1 %v570_v18  ;;  %v375_v63 = vld [vmem:[#allocation2 + $0x20] sm:$0xff]  ;;  %v393_v2 = vld [vmem:[#allocation2 + $0xb0] sm:$0xff]  ;;  %v378_v3 = vld [vmem:[#allocation2 + $0x38] sm:$0xff] }
  0x5f   : > { %862 = vmatpush1.msra.mxu0 %v551_v19  ;;  %931 = vmatpush1.msra.mxu1 %v569_v20  ;;  %v620_v4 = vld [vmem:[#allocation2 + $0x7c8] sm:$0xff]  ;;  %v377_v5 = vld [vmem:[#allocation2 + $0x30] sm:$0xff]  ;;  %v619_v6 = vld [vmem:[#allocation2 + $0x7c0] sm:$0xff] }
  0x60   : > { %863 = vmatprep.subr.mxu0 %v536_v21  ;;  %932 = vmatprep.subr.mxu1 %v554_v22  ;;  %v604_v7 = vld [vmem:[#allocation2 + $0x748] sm:$0xff]  ;;  %v622_v8 = vld [vmem:[#allocation2 + $0x7d8] sm:$0xff]  ;;  %v603_v9 = vld [vmem:[#allocation2 + $0x740] sm:$0xff] }
  0x61   : > { %864 = vmatpush1.msra.mxu0 %v535_v23  ;;  %933 = vmatpush1.msra.mxu1 %v553_v24  ;;  %v621_v10 = vld [vmem:[#allocation2 + $0x7d0] sm:$0xff]  ;;  %v588_v11 = vld [vmem:[#allocation2 + $0x6c8] sm:$0xff]  ;;  %v606_v12 = vld [vmem:[#allocation2 + $0x758] sm:$0xff] }
  0x62   : > { %865 = vmatprep.subr.mxu0 %v520_v25  ;;  %934 = vmatprep.subr.mxu1 %v538_v26  ;;  %v587_v13 = vld [vmem:[#allocation2 + $0x6c0] sm:$0xff]  ;;  %v605_v14 = vld [vmem:[#allocation2 + $0x750] sm:$0xff]  ;;  %v572_v15 = vld [vmem:[#allocation2 + $0x648] sm:$0xff] }
  0x63   : > { %866 = vmatpush1.msra.mxu0 %v519_v27  ;;  %935 = vmatpush1.msra.mxu1 %v537_v28  ;;  %v590_v16 = vld [vmem:[#allocation2 + $0x6d8] sm:$0xff]  ;;  %v571_v17 = vld [vmem:[#allocation2 + $0x640] sm:$0xff]  ;;  %v589_v18 = vld [vmem:[#allocation2 + $0x6d0] sm:$0xff] }
  0x64   : > { %867 = vmatprep.subr.mxu0 %v504_v29  ;;  %936 = vmatprep.subr.mxu1 %v522_v30  ;;  %v556_v19 = vld [vmem:[#allocation2 + $0x5c8] sm:$0xff]  ;;  %v574_v20 = vld [vmem:[#allocation2 + $0x658] sm:$0xff]  ;;  %v555_v21 = vld [vmem:[#allocation2 + $0x5c0] sm:$0xff] }
  0x65   : > { %868 = vmatpush1.msra.mxu0 %v503_v31  ;;  %937 = vmatpush1.msra.mxu1 %v521_v32  ;;  %v573_v22 = vld [vmem:[#allocation2 + $0x650] sm:$0xff]  ;;  %v540_v23 = vld [vmem:[#allocation2 + $0x548] sm:$0xff]  ;;  %v558_v24 = vld [vmem:[#allocation2 + $0x5d8] sm:$0xff] }
  0x66   : > { %869 = vmatprep.subr.mxu0 %v488_v33  ;;  %938 = vmatprep.subr.mxu1 %v506_v34  ;;  %v539_v25 = vld [vmem:[#allocation2 + $0x540] sm:$0xff]  ;;  %v557_v26 = vld [vmem:[#allocation2 + $0x5d0] sm:$0xff]  ;;  %v524_v27 = vld [vmem:[#allocation2 + $0x4c8] sm:$0xff] }
  0x67   : > { %870 = vmatpush1.msra.mxu0 %v487_v35  ;;  %939 = vmatpush1.msra.mxu1 %v505_v36  ;;  %v542_v28 = vld [vmem:[#allocation2 + $0x558] sm:$0xff]  ;;  %v523_v29 = vld [vmem:[#allocation2 + $0x4c0] sm:$0xff]  ;;  %v541_v30 = vld [vmem:[#allocation2 + $0x550] sm:$0xff] }
  0x68   : > { %871 = vmatprep.subr.mxu0 %v472_v37  ;;  %940 = vmatprep.subr.mxu1 %v490_v38  ;;  %v508_v31 = vld [vmem:[#allocation2 + $0x448] sm:$0xff]  ;;  %v526_v32 = vld [vmem:[#allocation2 + $0x4d8] sm:$0xff]  ;;  %v507_v33 = vld [vmem:[#allocation2 + $0x440] sm:$0xff] }
  0x69   : > { %872 = vmatpush1.msra.mxu0 %v471_v39  ;;  %941 = vmatpush1.msra.mxu1 %v489_v40  ;;  %v525_v34 = vld [vmem:[#allocation2 + $0x4d0] sm:$0xff]  ;;  %v492_v35 = vld [vmem:[#allocation2 + $0x3c8] sm:$0xff]  ;;  %v510_v36 = vld [vmem:[#allocation2 + $0x458] sm:$0xff] }
  0x6a   : > { %873 = vmatprep.subr.mxu0 %v456_v41  ;;  %942 = vmatprep.subr.mxu1 %v474_v42  ;;  %v491_v37 = vld [vmem:[#allocation2 + $0x3c0] sm:$0xff]  ;;  %v509_v38 = vld [vmem:[#allocation2 + $0x450] sm:$0xff]  ;;  %v476_v39 = vld [vmem:[#allocation2 + $0x348] sm:$0xff] }
  0x6b   : > { %874 = vmatpush1.msra.mxu0 %v455_v43  ;;  %943 = vmatpush1.msra.mxu1 %v473_v44  ;;  %v494_v40 = vld [vmem:[#allocation2 + $0x3d8] sm:$0xff]  ;;  %v475_v41 = vld [vmem:[#allocation2 + $0x340] sm:$0xff]  ;;  %v493_v42 = vld [vmem:[#allocation2 + $0x3d0] sm:$0xff] }
  0x6c   : > { %875 = vmatprep.subr.mxu0 %v440_v45  ;;  %944 = vmatprep.subr.mxu1 %v458_v46  ;;  %v460_v43 = vld [vmem:[#allocation2 + $0x2c8] sm:$0xff]  ;;  %v478_v44 = vld [vmem:[#allocation2 + $0x358] sm:$0xff]  ;;  %v459_v45 = vld [vmem:[#allocation2 + $0x2c0] sm:$0xff] }
  0x6d   : > { %876 = vmatpush1.msra.mxu0 %v439_v47  ;;  %945 = vmatpush1.msra.mxu1 %v457_v48  ;;  %v477_v46 = vld [vmem:[#allocation2 + $0x350] sm:$0xff]  ;;  %v444_v47 = vld [vmem:[#allocation2 + $0x248] sm:$0xff]  ;;  %v462_v48 = vld [vmem:[#allocation2 + $0x2d8] sm:$0xff] }
  0x6e   : > { %877 = vmatprep.subr.mxu0 %v424_v49  ;;  %946 = vmatprep.subr.mxu1 %v442_v50  ;;  %v443_v49 = vld [vmem:[#allocation2 + $0x240] sm:$0xff]  ;;  %v461_v50 = vld [vmem:[#allocation2 + $0x2d0] sm:$0xff] }
  0x6f   : > { %878 = vmatpush1.msra.mxu0 %v423_v51  ;;  %947 = vmatpush1.msra.mxu1 %v441_v52  ;;  %v428_v51 = vld [vmem:[#allocation2 + $0x1c8] sm:$0xff]  ;;  %v446_v52 = vld [vmem:[#allocation2 + $0x258] sm:$0xff] }
  0x70   : > { %879 = vmatprep.subr.mxu0 %v408_v53  ;;  %948 = vmatprep.subr.mxu1 %v426_v54  ;;  %v427_v53 = vld [vmem:[#allocation2 + $0x1c0] sm:$0xff]  ;;  %v445_v54 = vld [vmem:[#allocation2 + $0x250] sm:$0xff] }
  0x71   : > { %880 = vmatpush1.msra.mxu0 %v407_v55  ;;  %949 = vmatpush1.msra.mxu1 %v425_v56  ;;  %v412_v55 = vld [vmem:[#allocation2 + $0x148] sm:$0xff]  ;;  %v430_v56 = vld [vmem:[#allocation2 + $0x1d8] sm:$0xff] }
  0x72   : > { %881 = vmatprep.subr.mxu0 %v392_v57  ;;  %950 = vmatprep.subr.mxu1 %v410_v58  ;;  %v411_v57 = vld [vmem:[#allocation2 + $0x140] sm:$0xff]  ;;  %v429_v58 = vld [vmem:[#allocation2 + $0x1d0] sm:$0xff] }
  0x73   : > { %882 = vmatpush1.msra.mxu0 %v391_v59  ;;  %951 = vmatpush1.msra.mxu1 %v409_v60  ;;  %v396_v59 = vld [vmem:[#allocation2 + $0xc8] sm:$0xff]  ;;  %v414_v60 = vld [vmem:[#allocation2 + $0x158] sm:$0xff] }
  0x74   : > { %883 = vmatprep.subr.mxu0 %v376_v61  ;;  %952 = vmatprep.subr.mxu1 %v394_v62  ;;  %v395_v61 = vld [vmem:[#allocation2 + $0xc0] sm:$0xff]  ;;  %v413_v62 = vld [vmem:[#allocation2 + $0x150] sm:$0xff] }
  0x75   : > { %884 = vmatpush1.msra.mxu0 %v375_v63  ;;  %917 = vmatprep.mubr.f32.mxu0 %v2964_v0  ;;  %v380_v63 = vld [vmem:[#allocation2 + $0x48] sm:$0xff] }
  0x76   : > { %953 = vmatpush1.msra.mxu1 %v393_v2  ;;  %918 = vmatmul.mubr.f32.vlgmr.msra.gmra.mxu0 %v3102_v1  ;;  %v398_v2 = vld [vmem:[#allocation2 + $0xd8] sm:$0xff] }
  0x77   : > { %954 = vmatprep.subr.mxu1 %v378_v3  ;;  %995 = vmatprep.subr.mxu0 %v620_v4  ;;  %v379_v3 = vld [vmem:[#allocation2 + $0x40] sm:$0xff]  ;;  %v397_v4 = vld [vmem:[#allocation2 + $0xd0] sm:$0xff] }
  0x78   : > { %955 = vmatpush1.msra.mxu1 %v377_v5  ;;  %996 = vmatpush1.msra.mxu0 %v619_v6  ;;  %v382_v5 = vld [vmem:[#allocation2 + $0x58] sm:$0xff]  ;;  %v624_v6 = vld [vmem:[#allocation2 + $0x7e8] sm:$0xff] }
  0x79   : > { %988 = vmatprep.mubr.f32.mxu1 %v2964_v0  ;;  %997 = vmatprep.subr.mxu0 %v604_v7  ;;  %v381_v7 = vld [vmem:[#allocation2 + $0x50] sm:$0xff] }
  0x7a   : > { %1066 = vmatprep.subr.mxu1 %v622_v8  ;;  %989 = vmatmul.mubr.f32.vlgmr.msra.gmra.mxu1 %v3102_v1  ;;  %v623_v8 = vld [vmem:[#allocation2 + $0x7e0] sm:$0xff] }
  0x7b   : > { %998 = vmatpush1.msra.mxu0 %v603_v9  ;;  %1067 = vmatpush1.msra.mxu1 %v621_v10  ;;  %v608_v9 = vld [vmem:[#allocation2 + $0x768] sm:$0xff]  ;;  %v626_v10 = vld [vmem:[#allocation2 + $0x7f8] sm:$0xff] }
  0x7c   : > { %999 = vmatprep.subr.mxu0 %v588_v11  ;;  %1068 = vmatprep.subr.mxu1 %v606_v12  ;;  %v607_v11 = vld [vmem:[#allocation2 + $0x760] sm:$0xff]  ;;  %v625_v12 = vld [vmem:[#allocation2 + $0x7f0] sm:$0xff] }
  0x7d   : > { %1000 = vmatpush1.msra.mxu0 %v587_v13  ;;  %1069 = vmatpush1.msra.mxu1 %v605_v14  ;;  %v592_v13 = vld [vmem:[#allocation2 + $0x6e8] sm:$0xff]  ;;  %v610_v14 = vld [vmem:[#allocation2 + $0x778] sm:$0xff] }
  0x7e   : > { %1001 = vmatprep.subr.mxu0 %v572_v15  ;;  %1070 = vmatprep.subr.mxu1 %v590_v16  ;;  %v591_v15 = vld [vmem:[#allocation2 + $0x6e0] sm:$0xff]  ;;  %v609_v16 = vld [vmem:[#allocation2 + $0x770] sm:$0xff] }
  0x7f   : > { %1002 = vmatpush1.msra.mxu0 %v571_v17  ;;  %1071 = vmatpush1.msra.mxu1 %v589_v18  ;;  %v576_v17 = vld [vmem:[#allocation2 + $0x668] sm:$0xff]  ;;  %v594_v18 = vld [vmem:[#allocation2 + $0x6f8] sm:$0xff] }
  0x80   : > { %1003 = vmatprep.subr.mxu0 %v556_v19  ;;  %1072 = vmatprep.subr.mxu1 %v574_v20  ;;  %v575_v19 = vld [vmem:[#allocation2 + $0x660] sm:$0xff]  ;;  %v593_v20 = vld [vmem:[#allocation2 + $0x6f0] sm:$0xff] }
  0x81   : > { %1004 = vmatpush1.msra.mxu0 %v555_v21  ;;  %1073 = vmatpush1.msra.mxu1 %v573_v22  ;;  %v560_v21 = vld [vmem:[#allocation2 + $0x5e8] sm:$0xff]  ;;  %v578_v22 = vld [vmem:[#allocation2 + $0x678] sm:$0xff] }
  0x82   : > { %1005 = vmatprep.subr.mxu0 %v540_v23  ;;  %1074 = vmatprep.subr.mxu1 %v558_v24  ;;  %v559_v23 = vld [vmem:[#allocation2 + $0x5e0] sm:$0xff]  ;;  %v577_v24 = vld [vmem:[#allocation2 + $0x670] sm:$0xff] }
  0x83   : > { %1006 = vmatpush1.msra.mxu0 %v539_v25  ;;  %1075 = vmatpush1.msra.mxu1 %v557_v26  ;;  %v544_v25 = vld [vmem:[#allocation2 + $0x568] sm:$0xff]  ;;  %v562_v26 = vld [vmem:[#allocation2 + $0x5f8] sm:$0xff] }
  0x84   : > { %1007 = vmatprep.subr.mxu0 %v524_v27  ;;  %1076 = vmatprep.subr.mxu1 %v542_v28  ;;  %v543_v27 = vld [vmem:[#allocation2 + $0x560] sm:$0xff]  ;;  %v561_v28 = vld [vmem:[#allocation2 + $0x5f0] sm:$0xff] }
  0x85   : > { %1008 = vmatpush1.msra.mxu0 %v523_v29  ;;  %1077 = vmatpush1.msra.mxu1 %v541_v30  ;;  %v528_v29 = vld [vmem:[#allocation2 + $0x4e8] sm:$0xff]  ;;  %v546_v30 = vld [vmem:[#allocation2 + $0x578] sm:$0xff] }
  0x86   : > { %1009 = vmatprep.subr.mxu0 %v508_v31  ;;  %1078 = vmatprep.subr.mxu1 %v526_v32  ;;  %v527_v31 = vld [vmem:[#allocation2 + $0x4e0] sm:$0xff]  ;;  %v545_v32 = vld [vmem:[#allocation2 + $0x570] sm:$0xff] }
  0x87   : > { %1010 = vmatpush1.msra.mxu0 %v507_v33  ;;  %1079 = vmatpush1.msra.mxu1 %v525_v34  ;;  %v512_v33 = vld [vmem:[#allocation2 + $0x468] sm:$0xff]  ;;  %v530_v34 = vld [vmem:[#allocation2 + $0x4f8] sm:$0xff] }
  0x88   : > { %1011 = vmatprep.subr.mxu0 %v492_v35  ;;  %1080 = vmatprep.subr.mxu1 %v510_v36  ;;  %v511_v35 = vld [vmem:[#allocation2 + $0x460] sm:$0xff]  ;;  %v529_v36 = vld [vmem:[#allocation2 + $0x4f0] sm:$0xff] }
  0x89   : > { %1012 = vmatpush1.msra.mxu0 %v491_v37  ;;  %1081 = vmatpush1.msra.mxu1 %v509_v38  ;;  %v496_v37 = vld [vmem:[#allocation2 + $0x3e8] sm:$0xff]  ;;  %v514_v38 = vld [vmem:[#allocation2 + $0x478] sm:$0xff] }
  0x8a   : > { %1013 = vmatprep.subr.mxu0 %v476_v39  ;;  %1082 = vmatprep.subr.mxu1 %v494_v40  ;;  %v495_v39 = vld [vmem:[#allocation2 + $0x3e0] sm:$0xff]  ;;  %v513_v40 = vld [vmem:[#allocation2 + $0x470] sm:$0xff] }
  0x8b   : > { %1014 = vmatpush1.msra.mxu0 %v475_v41  ;;  %1083 = vmatpush1.msra.mxu1 %v493_v42  ;;  %v480_v41 = vld [vmem:[#allocation2 + $0x368] sm:$0xff]  ;;  %v498_v42 = vld [vmem:[#allocation2 + $0x3f8] sm:$0xff] }
  0x8c   : > { %1015 = vmatprep.subr.mxu0 %v460_v43  ;;  %1084 = vmatprep.subr.mxu1 %v478_v44  ;;  %v479_v43 = vld [vmem:[#allocation2 + $0x360] sm:$0xff]  ;;  %v497_v44 = vld [vmem:[#allocation2 + $0x3f0] sm:$0xff] }
  0x8d   : > { %1016 = vmatpush1.msra.mxu0 %v459_v45  ;;  %1085 = vmatpush1.msra.mxu1 %v477_v46  ;;  %v464_v45 = vld [vmem:[#allocation2 + $0x2e8] sm:$0xff]  ;;  %v482_v46 = vld [vmem:[#allocation2 + $0x378] sm:$0xff] }
  0x8e   : > { %1017 = vmatprep.subr.mxu0 %v444_v47  ;;  %1086 = vmatprep.subr.mxu1 %v462_v48  ;;  %v463_v47 = vld [vmem:[#allocation2 + $0x2e0] sm:$0xff]  ;;  %v481_v48 = vld [vmem:[#allocation2 + $0x370] sm:$0xff] }
  0x8f   : > { %1018 = vmatpush1.msra.mxu0 %v443_v49  ;;  %1087 = vmatpush1.msra.mxu1 %v461_v50  ;;  %v448_v49 = vld [vmem:[#allocation2 + $0x268] sm:$0xff]  ;;  %v466_v50 = vld [vmem:[#allocation2 + $0x2f8] sm:$0xff] }
  0x90   : > { %1019 = vmatprep.subr.mxu0 %v428_v51  ;;  %1088 = vmatprep.subr.mxu1 %v446_v52  ;;  %v447_v51 = vld [vmem:[#allocation2 + $0x260] sm:$0xff]  ;;  %v465_v52 = vld [vmem:[#allocation2 + $0x2f0] sm:$0xff] }
  0x91   : > { %1020 = vmatpush1.msra.mxu0 %v427_v53  ;;  %1089 = vmatpush1.msra.mxu1 %v445_v54  ;;  %v432_v53 = vld [vmem:[#allocation2 + $0x1e8] sm:$0xff]  ;;  %v450_v54 = vld [vmem:[#allocation2 + $0x278] sm:$0xff] }
  0x92   : > { %1021 = vmatprep.subr.mxu0 %v412_v55  ;;  %1090 = vmatprep.subr.mxu1 %v430_v56  ;;  %v431_v55 = vld [vmem:[#allocation2 + $0x1e0] sm:$0xff]  ;;  %v449_v56 = vld [vmem:[#allocation2 + $0x270] sm:$0xff] }
  0x93   : > { %1022 = vmatpush1.msra.mxu0 %v411_v57  ;;  %1091 = vmatpush1.msra.mxu1 %v429_v58  ;;  %v416_v57 = vld [vmem:[#allocation2 + $0x168] sm:$0xff]  ;;  %v434_v58 = vld [vmem:[#allocation2 + $0x1f8] sm:$0xff] }
  0x94   : > { %1023 = vmatprep.subr.mxu0 %v396_v59  ;;  %1092 = vmatprep.subr.mxu1 %v414_v60  ;;  %v415_v59 = vld [vmem:[#allocation2 + $0x160] sm:$0xff]  ;;  %v433_v60 = vld [vmem:[#allocation2 + $0x1f0] sm:$0xff] }
  0x95   : > { %1024 = vmatpush1.msra.mxu0 %v395_v61  ;;  %1093 = vmatpush1.msra.mxu1 %v413_v62  ;;  %v400_v61 = vld [vmem:[#allocation2 + $0xe8] sm:$0xff]  ;;  %v418_v62 = vld [vmem:[#allocation2 + $0x178] sm:$0xff] }
  0x96   : > { %1025 = vmatprep.subr.mxu0 %v380_v63  ;;  %1094 = vmatprep.subr.mxu1 %v398_v2  ;;  %v399_v63 = vld [vmem:[#allocation2 + $0xe0] sm:$0xff]  ;;  %v417_v2 = vld [vmem:[#allocation2 + $0x170] sm:$0xff] }
  0x97   : > { %1026 = vmatpush1.msra.mxu0 %v379_v3  ;;  %1059 = vmatprep.mubr.f32.mxu0 %v2964_v0  ;;  %v384_v3 = vld [vmem:[#allocation2 + $0x68] sm:$0xff] }
  0x98   : > { %1095 = vmatpush1.msra.mxu1 %v397_v4  ;;  %1060 = vmatmul.mubr.f32.vlgmr.msra.gmra.mxu0 %v3102_v1  ;;  %v402_v4 = vld [vmem:[#allocation2 + $0xf8] sm:$0xff] }
  0x99   : > { %1096 = vmatprep.subr.mxu1 %v382_v5  ;;  %1137 = vmatprep.subr.mxu0 %v624_v6  ;;  %v383_v5 = vld [vmem:[#allocation2 + $0x60] sm:$0xff]  ;;  %v401_v6 = vld [vmem:[#allocation2 + $0xf0] sm:$0xff] }
  0x9a   : > { %1097 = vmatpush1.msra.mxu1 %v381_v7  ;;  %1138 = vmatpush1.msra.mxu0 %v623_v8  ;;  %v386_v7 = vld [vmem:[#allocation2 + $0x78] sm:$0xff]  ;;  %v385_v8 = vld [vmem:[#allocation2 + $0x70] sm:$0xff] }
  0x9b   : > { %1130 = vmatprep.mubr.f32.mxu1 %v2964_v0  ;;  %1139 = vmatprep.subr.mxu0 %v608_v9  ;;  %v631_v9 = vlaneseq }
  0x9c   : > { %1208 = vmatprep.subr.mxu1 %v626_v10  ;;  %1131 = vmatmul.mubr.f32.vlgmr.msra.gmra.mxu1 %v3102_v1 }
  0x9d   : > { %1140 = vmatpush1.msra.mxu0 %v607_v11  ;;  %1209 = vmatpush1.msra.mxu1 %v625_v12  ;;  %v632_v10 = vshrl.u32 %v631_v9, 7 }
  0x9e   : > { %1141 = vmatprep.subr.mxu0 %v592_v13  ;;  %1210 = vmatprep.subr.mxu1 %v610_v14  ;;  %v627_v13 = vld [vmem:[%s3421_s2] sm:$0xff] }
  0x9f   : > { %1142 = vmatpush1.msra.mxu0 %v591_v15  ;;  %1211 = vmatpush1.msra.mxu1 %v609_v16  ;;  %v3118_v11 = vsub.s32 0, %v632_v10  ;;  %v3120_v12 = vsub.s32 1, %v632_v10 }
  0xa0   : > { %1143 = vmatprep.subr.mxu0 %v576_v17  ;;  %1212 = vmatprep.subr.mxu1 %v594_v18  ;;  %v3127_v17 = vsub.s32 2, %v632_v10 }
  0xa1   : > { %1144 = vmatpush1.msra.mxu0 %v575_v19  ;;  %1213 = vmatpush1.msra.mxu1 %v593_v20  ;;  %v634_v15 = vrot.slane %v627_v13, %v3118_v11  ;;  %v638_v16 = vrot.slane %v627_v13, %v3120_v12  ;;  %v3134_v20 = vsub.s32 3, %v632_v10 }
  0xa2   : > { %1145 = vmatprep.subr.mxu0 %v560_v21  ;;  %1214 = vmatprep.subr.mxu1 %v578_v22  ;;  %v642_v19 = vrot.slane %v627_v13, %v3127_v17  ;;  %v3136_v22 = vsub.s32 4, %v632_v10 }
  0xa3   : > { %1146 = vmatpush1.msra.mxu0 %v559_v23  ;;  %1215 = vmatpush1.msra.mxu1 %v577_v24 }
  0xa4   : > { %1147 = vmatprep.subr.mxu0 %v544_v25  ;;  %1216 = vmatprep.subr.mxu1 %v562_v26  ;;  %v646_v25 = vrot.slane %v627_v13, %v3134_v20 }
  0xa5   : > { %1148 = vmatpush1.msra.mxu0 %v543_v27  ;;  %1217 = vmatpush1.msra.mxu1 %v561_v28  ;;  %v650_v27 = vrot.slane %v627_v13, %v3136_v22  ;;  %v3144_v28 = vsub.s32 5, %v632_v10 }
  0xa6   : > { %1149 = vmatprep.subr.mxu0 %v528_v29  ;;  %1218 = vmatprep.subr.mxu1 %v546_v30 }
  0xa7   : > { %1150 = vmatpush1.msra.mxu0 %v527_v31  ;;  %1219 = vmatpush1.msra.mxu1 %v545_v32 }
  0xa8   : > { %1151 = vmatprep.subr.mxu0 %v512_v33  ;;  %1220 = vmatprep.subr.mxu1 %v530_v34  ;;  %v654_v33 = vrot.slane %v627_v13, %v3144_v28  ;;  %v3152_v34 = vsub.s32 6, %v632_v10 }
  0xa9   : > { %1152 = vmatpush1.msra.mxu0 %v511_v35  ;;  %1221 = vmatpush1.msra.mxu1 %v529_v36 }
  0xaa   : > { %1153 = vmatprep.subr.mxu0 %v496_v37  ;;  %1222 = vmatprep.subr.mxu1 %v514_v38 }
  0xab   : > { %1154 = vmatpush1.msra.mxu0 %v495_v39  ;;  %1223 = vmatpush1.msra.mxu1 %v513_v40  ;;  %v658_v39 = vrot.slane %v627_v13, %v3152_v34  ;;  %v3159_v40 = vsub.s32 7, %v632_v10 }
  0xac   : > { %1155 = vmatprep.subr.mxu0 %v480_v41  ;;  %1224 = vmatprep.subr.mxu1 %v498_v42  ;;  %v628_v42 = vld [vmem:[%s3421_s2 + $0x8] sm:$0xff] }
  0xad   : > { %1156 = vmatpush1.msra.mxu0 %v479_v43  ;;  %1225 = vmatpush1.msra.mxu1 %v497_v44 }
  0xae   : > { %1157 = vmatprep.subr.mxu0 %v464_v45  ;;  %1226 = vmatprep.subr.mxu1 %v482_v46  ;;  %v662_v45 = vrot.slane %v627_v13, %v3159_v40 }
  0xaf   : > { %1158 = vmatpush1.msra.mxu0 %v463_v47  ;;  %1227 = vmatpush1.msra.mxu1 %v481_v48  ;;  %v666_v47 = vrot.slane %v628_v42, %v3118_v11 }
  0xb0   : > { %1159 = vmatprep.subr.mxu0 %v448_v49  ;;  %1228 = vmatprep.subr.mxu1 %v466_v50 }
  0xb1   : > { %1160 = vmatpush1.msra.mxu0 %v447_v51  ;;  %1229 = vmatpush1.msra.mxu1 %v465_v52  ;;  %v670_v52 = vrot.slane %v628_v42, %v3120_v12 }
  0xb2   : > { %1161 = vmatprep.subr.mxu0 %v432_v53  ;;  %1230 = vmatprep.subr.mxu1 %v450_v54 }
  0xb3   : > { %1162 = vmatpush1.msra.mxu0 %v431_v55  ;;  %1231 = vmatpush1.msra.mxu1 %v449_v56 }
  0xb4   : > { %1163 = vmatprep.subr.mxu0 %v416_v57  ;;  %1232 = vmatprep.subr.mxu1 %v434_v58  ;;  %v674_v57 = vrot.slane %v628_v42, %v3127_v17 }
  0xb5   : > { %1164 = vmatpush1.msra.mxu0 %v415_v59  ;;  %1233 = vmatpush1.msra.mxu1 %v433_v60 }
  0xb6   : > { %1165 = vmatprep.subr.mxu0 %v400_v61  ;;  %1234 = vmatprep.subr.mxu1 %v418_v62  ;;  %v678_v61 = vrot.slane %v628_v42, %v3134_v20 }
  0xb7   : > { %1166 = vmatpush1.msra.mxu0 %v399_v63  ;;  %1235 = vmatpush1.msra.mxu1 %v417_v2 }
  0xb8   : > { %1167 = vmatprep.subr.mxu0 %v384_v3  ;;  %1236 = vmatprep.subr.mxu1 %v402_v4  ;;  %v682_v3 = vrot.slane %v628_v42, %v3136_v22  ;;  %v686_v4 = vrot.slane %v628_v42, %v3144_v28 }
  0xb9   : > { %1168 = vmatpush1.msra.mxu0 %v383_v5  ;;  %1201 = vmatprep.mubr.f32.mxu0 %v2964_v0  ;;  %v690_v5 = vrot.slane %v628_v42, %v3152_v34 }
  0xba   : > { %1237 = vmatpush1.msra.mxu1 %v401_v6  ;;  %1202 = vmatmul.mubr.f32.vlgmr.msra.gmra.mxu0 %v3102_v1 }
  0xbb   : > { %1238 = vmatprep.subr.mxu1 %v386_v7  ;;  %1272 = vmatprep.mubr.f32.mxu1 %v2964_v0 }
  0xbc   : > { %1239 = vmatpush1.msra.mxu1 %v385_v8 }
  0xbd   : > { %1273 = vmatmul.mubr.f32.vlgmr.msra.gmra.mxu1 %v3102_v1 }
 0x116   : > { %v777_v14 = vpop.f32.mrf.mxu0 }
 0x117   : > { %v3129_v18 = vadd.f32 %v777_v14, %v634_v15 }
 0x118   : > { %v779_v0 = vpop.f32.mrf.mxu0  ;;  %v848_v21 = vpop.f32.mrf.mxu1 }
 0x119   : > { %v3131_v1 = vadd.f32 %v779_v0, %v638_v16  ;;  %v3140_v24 = vadd.f32 %v848_v21, %v642_v19  ;;  %v694_v16 = vrot.slane %v628_v42, %v3159_v40  ;;  %v1594_v42 = vld [vmem:[#allocation6 + $0x68] sm:$0xff] }
 0x11a   : > { %v850_v26 = vpop.f32.mrf.mxu1 }
 0x11b   : > { %v1279_v23 = vadd.f32 %v3131_v1, %v3129_v18  ;;  %v3147_v31 = vadd.f32 %v850_v26, %v646_v25  ;;  %v1612_v26 = vld [vmem:[#allocation6 + $0xf8] sm:$0xff] }
 0x11c   : > { %2537 = vmatprep.subr.mxu0 %v1612_v26 }
 0x11d   : > { %v1280_v30 = vadd.f32 %v1279_v23, %v3140_v24 }
 0x11f   : > { %v1281_v36 = vadd.f32 %v1280_v30, %v3147_v31  ;;  %v1628_v30 = vld [vmem:[#allocation6 + $0x178] sm:$0xff] }
 0x136   : > { %v919_v29 = vpop.f32.mrf.mxu0 }
 0x137   : > { %v3149_v32 = vadd.f32 %v919_v29, %v650_v27  ;;  %v1644_v27 = vld [vmem:[#allocation6 + $0x1f8] sm:$0xff] }
 0x138   : > { %v921_v35 = vpop.f32.mrf.mxu0  ;;  %v1596_v29 = vld [vmem:[#allocation6 + $0x78] sm:$0xff]  ;;  %2572 = vmatprep.subr.mxu1 %v1644_v27 }
 0x139   : > { %v1282_v37 = vadd.f32 %v1281_v36, %v3149_v32  ;;  %v3156_v38 = vadd.f32 %v921_v35, %v654_v33  ;;  %v1611_v33 = vld [vmem:[#allocation6 + $0xf0] sm:$0xff]  ;;  %2538 = vmatpush3.msra.mxu0 %v1596_v29  ;;  %2573 = vmatpush3.msra.mxu1 %v1628_v30 }
 0x13a   : > { %v990_v41 = vpop.f32.mrf.mxu1  ;;  %v1643_v35 = vld [vmem:[#allocation6 + $0x1f0] sm:$0xff]  ;;  %2539 = vmatprep.subr.mxu0 %v1611_v33 }
 0x13b   : > { %v1283_v43 = vadd.f32 %v1282_v37, %v3156_v38  ;;  %v3165_v44 = vadd.f32 %v990_v41, %v658_v39  ;;  %v1595_v36 = vld [vmem:[#allocation6 + $0x70] sm:$0xff]  ;;  %v1610_v39 = vld [vmem:[#allocation6 + $0xe8] sm:$0xff]  ;;  %2574 = vmatprep.subr.mxu1 %v1643_v35 }
 0x13c   : > { %v992_v46 = vpop.f32.mrf.mxu1  ;;  %v1627_v37 = vld [vmem:[#allocation6 + $0x170] sm:$0xff]  ;;  %v1642_v41 = vld [vmem:[#allocation6 + $0x1e8] sm:$0xff]  ;;  %2540 = vmatpush3.msra.mxu0 %v1595_v36  ;;  %v1609_v36 = vld [vmem:[#allocation6 + $0xe0] sm:$0xff] }
 0x13d   : > { %v1284_v49 = vadd.f32 %v1283_v43, %v3165_v44  ;;  %v3170_v50 = vadd.f32 %v992_v46, %v662_v45  ;;  %v1626_v43 = vld [vmem:[#allocation6 + $0x168] sm:$0xff]  ;;  %2575 = vmatpush3.msra.mxu1 %v1627_v37  ;;  %2541 = vmatprep.subr.mxu0 %v1610_v39  ;;  %v1641_v37 = vld [vmem:[#allocation6 + $0x1e0] sm:$0xff] }
 0x13e   : > { %2576 = vmatprep.subr.mxu1 %v1642_v41  ;;  %2542 = vmatpush3.msra.mxu0 %v1594_v42  ;;  %v1625_v39 = vld [vmem:[#allocation6 + $0x160] sm:$0xff]  ;;  %v1608_v41 = vld [vmem:[#allocation6 + $0xd8] sm:$0xff] }
 0x13f   : > { %v1285_v54 = vadd.f32 %v1284_v49, %v3170_v50  ;;  %2577 = vmatpush3.msra.mxu1 %v1626_v43  ;;  %2543 = vmatprep.subr.mxu0 %v1609_v36  ;;  %v1640_v42 = vld [vmem:[#allocation6 + $0x1d8] sm:$0xff]  ;;  %v1599_v36 = vld [vmem:[#allocation6 + $0x90] sm:$0xff] }
 0x140   : > { %2578 = vmatprep.subr.mxu1 %v1641_v37  ;;  %v1592_v43 = vld [vmem:[#allocation6 + $0x58] sm:$0xff]  ;;  %v1631_v37 = vld [vmem:[#allocation6 + $0x190] sm:$0xff] }
 0x141   : > { %2579 = vmatpush3.msra.mxu1 %v1625_v39  ;;  %v1615_v39 = vld [vmem:[#allocation6 + $0x110] sm:$0xff] }
 0x142   : > { %2580 = vmatprep.subr.mxu1 %v1640_v42  ;;  %v1630_v42 = vld [vmem:[#allocation6 + $0x188] sm:$0xff] }
 0x158   : > { %v1061_v48 = vpop.f32.mrf.mxu0 }
 0x159   : > { %v3172_v51 = vadd.f32 %v1061_v48, %v666_v47 }
 0x15a   : > { %v1063_v53 = vpop.f32.mrf.mxu0 }
 0x15b   : > { %v1286_v55 = vadd.f32 %v1285_v54, %v3172_v51  ;;  %v3177_v56 = vadd.f32 %v1063_v53, %v670_v52 }
 0x15c   : > { %v1132_v58 = vpop.f32.mrf.mxu1 }
 0x15d   : > { %v1287_v59 = vadd.f32 %v1286_v55, %v3177_v56  ;;  %v3181_v60 = vadd.f32 %v1132_v58, %v674_v57 }
 0x15e   : > { %v1134_v62 = vpop.f32.mrf.mxu1 }
 0x15f   : > { %v1288_v63 = vadd.f32 %v1287_v59, %v3181_v60  ;;  %v3185_v2 = vadd.f32 %v1134_v62, %v678_v61 }
 0x161   : > { %v1289_v7 = vadd.f32 %v1288_v63, %v3185_v2 }
 0x17a   : > { %v1203_v6 = vpop.f32.mrf.mxu0 }
 0x17b   : > { %v3191_v8 = vadd.f32 %v1203_v6, %v682_v3 }
 0x17c   : > { %v1205_v9 = vpop.f32.mrf.mxu0 }
 0x17d   : > { %v1274_v10 = vpop.f32.mrf.mxu1  ;;  %v1290_v13 = vadd.f32 %v1289_v7, %v3191_v8  ;;  %v3194_v14 = vadd.f32 %v1205_v9, %v686_v4 }
 0x17e   : > { %v3196_v15 = vadd.f32 %v1274_v10, %v690_v5 }
 0x17f   : > { %v1276_v0 = vpop.f32.mrf.mxu1  ;;  %v1291_v19 = vadd.f32 %v1290_v13, %v3194_v14 }
 0x180   : > { %v3200_v21 = vadd.f32 %v1276_v0, %v694_v16 }
 0x181   : > { %v1292_v23 = vadd.f32 %v1291_v19, %v3196_v15 }
 0x183   : > { %v1293_v25 = vadd.f32 %v1292_v23, %v3200_v21 }
 0x185   : > { %1294 = vadd.xlane.f32.xlu0 %v1293_v25 }
 0x20e   : > { %v1295_v45 = vpop.xlane.xlu0 %1294 }
 0x20f   : > { %v1296_v46 = vmul.f32 0.00048828125, %v1295_v45  ;;  %v1624_v45 = vld [vmem:[#allocation6 + $0x158] sm:$0xff] }
 0x210   : > { %2581 = vmatpush3.msra.mxu1 %v1624_v45  ;;  %v1614_v45 = vld [vmem:[#allocation6 + $0x108] sm:$0xff] }
 0x211   : > { %v3205_v47 = vsub.f32 %v3129_v18, %v1296_v46  ;;  %v3208_v48 = vsub.f32 %v3131_v1, %v1296_v46  ;;  %v3211_v49 = vsub.f32 %v3140_v24, %v1296_v46  ;;  %v3218_v54 = vsub.f32 %v3147_v31, %v1296_v46 }
 0x212   : > { %v3221_v55 = vsub.f32 %v3149_v32, %v1296_v46  ;;  %v3226_v57 = vsub.f32 %v3156_v38, %v1296_v46  ;;  %v3231_v59 = vsub.f32 %v3165_v44, %v1296_v46  ;;  %v3236_v32 = vsub.f32 %v3170_v50, %v1296_v46 }
 0x213   : > { %v1313_v52 = vmul.f32 %v3205_v47, %v3205_v47  ;;  %v1314_v53 = vmul.f32 %v3208_v48, %v3208_v48  ;;  %v1315_v18 = vmul.f32 %v3211_v49, %v3211_v49  ;;  %v1316_v24 = vmul.f32 %v3218_v54, %v3218_v54 }
 0x214   : > { %v1317_v31 = vmul.f32 %v3221_v55, %v3221_v55  ;;  %v1318_v62 = vmul.f32 %v3226_v57, %v3226_v57  ;;  %v3241_v38 = vsub.f32 %v3172_v51, %v1296_v46  ;;  %v1319_v3 = vmul.f32 %v3231_v59, %v3231_v59 }
 0x215   : > { %v1329_v1 = vadd.f32 %v1314_v53, %v1313_v52  ;;  %v3246_v44 = vsub.f32 %v3177_v56, %v1296_v46  ;;  %v1320_v5 = vmul.f32 %v3236_v32, %v3236_v32  ;;  %v3251_v50 = vsub.f32 %v3181_v60, %v1296_v46  ;;  %v1639_v52 = vld [vmem:[#allocation6 + $0x1d0] sm:$0xff] }
 0x216   : > { %v1321_v7 = vmul.f32 %v3241_v38, %v3241_v38  ;;  %v3256_v51 = vsub.f32 %v3185_v2, %v1296_v46  ;;  %v3261_v56 = vsub.f32 %v3191_v8, %v1296_v46  ;;  %v3266_v60 = vsub.f32 %v3194_v14, %v1296_v46  ;;  %v1591_v53 = vld [vmem:[#allocation6 + $0x50] sm:$0xff]  ;;  %2582 = vmatprep.subr.mxu1 %v1639_v52  ;;  %v1629_v52 = vld [vmem:[#allocation6 + $0x180] sm:$0xff] }
 0x217   : > { %v1330_v58 = vadd.f32 %v1329_v1, %v1315_v18  ;;  %v1322_v10 = vmul.f32 %v3246_v44, %v3246_v44  ;;  %v1323_v16 = vmul.f32 %v3251_v50, %v3251_v50  ;;  %v3271_v2 = vsub.f32 %v3196_v15, %v1296_v46  ;;  %v1623_v18 = vld [vmem:[#allocation6 + $0x150] sm:$0xff]  ;;  %v1606_v1 = vld [vmem:[#allocation6 + $0xc8] sm:$0xff] }
 0x218   : > { %v1324_v19 = vmul.f32 %v3256_v51, %v3256_v51  ;;  %v1325_v25 = vmul.f32 %v3261_v56, %v3261_v56  ;;  %v3276_v8 = vsub.f32 %v3200_v21, %v1296_v46  ;;  %v1326_v27 = vmul.f32 %v3266_v60, %v3266_v60  ;;  %v1593_v21 = vld [vmem:[#allocation6 + $0x60] sm:$0xff]  ;;  %v1607_v46 = vld [vmem:[#allocation6 + $0xd0] sm:$0xff]  ;;  %2583 = vmatpush3.msra.mxu1 %v1623_v18 }
 0x219   : > { %v1331_v61 = vadd.f32 %v1330_v58, %v1316_v24  ;;  %v1327_v14 = vmul.f32 %v3271_v2, %v3271_v2  ;;  %2544 = vmatpush3.msra.mxu0 %v1593_v21  ;;  %v1638_v24 = vld [vmem:[#allocation6 + $0x1c8] sm:$0xff]  ;;  %v1583_v21 = vld [vmem:[#allocation6 + $0x10] sm:$0xff]  ;;  %v1613_v18 = vld [vmem:[#allocation6 + $0x100] sm:$0xff] }
 0x21a   : > { %v1328_v33 = vmul.f32 %v3276_v8, %v3276_v8  ;;  %2545 = vmatprep.subr.mxu0 %v1608_v41  ;;  %v1590_v58 = vld [vmem:[#allocation6 + $0x48] sm:$0xff]  ;;  %2584 = vmatprep.subr.mxu1 %v1638_v24  ;;  %v1708_v24 = vld [vmem:[#allocation6 + $0x3f8] sm:$0xff] }
 0x21b   : > { %v1332_v63 = vadd.f32 %v1331_v61, %v1317_v31  ;;  %2546 = vmatpush3.msra.mxu0 %v1592_v43  ;;  %v1622_v31 = vld [vmem:[#allocation6 + $0x148] sm:$0xff]  ;;  %v1605_v61 = vld [vmem:[#allocation6 + $0xc0] sm:$0xff] }
 0x21c   : > { %2547 = vmatprep.subr.mxu0 %v1607_v46  ;;  %2585 = vmatpush3.msra.mxu1 %v1622_v31  ;;  %v1598_v41 = vld [vmem:[#allocation6 + $0x88] sm:$0xff]  ;;  %v1597_v46 = vld [vmem:[#allocation6 + $0x80] sm:$0xff] }
 0x21d   : > { %v1333_v4 = vadd.f32 %v1332_v63, %v1318_v62  ;;  %2548 = vmatpush3.msra.mxu0 %v1591_v53  ;;  %v1637_v62 = vld [vmem:[#allocation6 + $0x1c0] sm:$0xff]  ;;  %v1582_v43 = vld [vmem:[#allocation6 + $0x8] sm:$0xff] }
 0x21e   : > { %2549 = vmatprep.subr.mxu0 %v1606_v1  ;;  %v1589_v63 = vld [vmem:[#allocation6 + $0x40] sm:$0xff]  ;;  %2586 = vmatprep.subr.mxu1 %v1637_v62  ;;  %v1676_v1 = vld [vmem:[#allocation6 + $0x2f8] sm:$0xff]  ;;  %v3287_v62 = vld [vmem:[%s3422_s3] sm:$0xff] }
 0x21f   : > { %v1334_v6 = vadd.f32 %v1333_v4, %v1319_v3  ;;  %v1621_v3 = vld [vmem:[#allocation6 + $0x140] sm:$0xff]  ;;  %2550 = vmatpush3.msra.mxu0 %v1590_v58  ;;  %v1604_v4 = vld [vmem:[#allocation6 + $0xb8] sm:$0xff] }
 0x220   : > { %2551 = vmatprep.subr.mxu0 %v1605_v61  ;;  %2587 = vmatpush3.msra.mxu1 %v1621_v3  ;;  %v1581_v53 = vld [vmem:[#allocation6] sm:$0xff]  ;;  %v1376_v3 = vrot.slane %v3287_v62, %v3120_v12 }
 0x221   : > { %v1335_v9 = vadd.f32 %v1334_v6, %v1320_v5  ;;  %v1636_v5 = vld [vmem:[#allocation6 + $0x1b8] sm:$0xff]  ;;  %2552 = vmatpush3.msra.mxu0 %v1589_v63  ;;  %v3289_v63 = vld [vmem:[#allocation4] sm:$0xff] }
 0x222   : > { %v1588_v6 = vld [vmem:[#allocation6 + $0x38] sm:$0xff]  ;;  %2553 = vmatprep.subr.mxu0 %v1604_v4  ;;  %2588 = vmatprep.subr.mxu1 %v1636_v5  ;;  %v1384_v4 = vrot.slane %v3287_v62, %v3134_v20  ;;  %v1372_v5 = vrot.slane %v3287_v62, %v3118_v11 }
 0x223   : > { %v1336_v13 = vadd.f32 %v1335_v9, %v1321_v7  ;;  %v1620_v7 = vld [vmem:[#allocation6 + $0x138] sm:$0xff]  ;;  %v1603_v9 = vld [vmem:[#allocation6 + $0xb0] sm:$0xff]  ;;  %2554 = vmatpush3.msra.mxu0 %v1588_v6  ;;  %v1380_v6 = vrot.slane %v3287_v62, %v3127_v17 }
 0x224   : > { %2589 = vmatpush3.msra.mxu1 %v1620_v7  ;;  %2555 = vmatprep.subr.mxu0 %v1603_v9  ;;  %v1392_v7 = vrot.slane %v3287_v62, %v3144_v28  ;;  %v1400_v9 = vrot.slane %v3287_v62, %v3159_v40 }
 0x225   : > { %v1337_v0 = vadd.f32 %v1336_v13, %v1322_v10  ;;  %v1635_v10 = vld [vmem:[#allocation6 + $0x1b0] sm:$0xff] }
 0x226   : > { %v1587_v13 = vld [vmem:[#allocation6 + $0x30] sm:$0xff]  ;;  %2590 = vmatprep.subr.mxu1 %v1635_v10 }
 0x227   : > { %v1338_v23 = vadd.f32 %v1337_v0, %v1323_v16  ;;  %v1619_v16 = vld [vmem:[#allocation6 + $0x130] sm:$0xff]  ;;  %v1602_v0 = vld [vmem:[#allocation6 + $0xa8] sm:$0xff]  ;;  %2556 = vmatpush3.msra.mxu0 %v1587_v13  ;;  %v1476_v13 = vrot.slane %v3289_v63, %v3120_v12 }
 0x228   : > { %2591 = vmatpush3.msra.mxu1 %v1619_v16  ;;  %2557 = vmatprep.subr.mxu0 %v1602_v0  ;;  %v1484_v16 = vrot.slane %v3289_v63, %v3134_v20  ;;  %v1472_v0 = vrot.slane %v3289_v63, %v3118_v11 }
 0x229   : > { %v1339_v26 = vadd.f32 %v1338_v23, %v1324_v19  ;;  %v1634_v19 = vld [vmem:[#allocation6 + $0x1a8] sm:$0xff] }
 0x22a   : > { %v1586_v23 = vld [vmem:[#allocation6 + $0x28] sm:$0xff]  ;;  %2592 = vmatprep.subr.mxu1 %v1634_v19  ;;  %v1480_v19 = vrot.slane %v3289_v63, %v3127_v17 }
 0x22b   : > { %v1340_v29 = vadd.f32 %v1339_v26, %v1325_v25  ;;  %v1618_v25 = vld [vmem:[#allocation6 + $0x128] sm:$0xff]  ;;  %v1601_v26 = vld [vmem:[#allocation6 + $0xa0] sm:$0xff]  ;;  %2558 = vmatpush3.msra.mxu0 %v1586_v23 }
 0x22c   : > { %2593 = vmatpush3.msra.mxu1 %v1618_v25  ;;  %2559 = vmatprep.subr.mxu0 %v1601_v26 }
 0x22d   : > { %v1341_v30 = vadd.f32 %v1340_v29, %v1326_v27  ;;  %v1633_v27 = vld [vmem:[#allocation6 + $0x1a0] sm:$0xff] }
 0x22e   : > { %v1585_v29 = vld [vmem:[#allocation6 + $0x20] sm:$0xff]  ;;  %2594 = vmatprep.subr.mxu1 %v1633_v27 }
 0x22f   : > { %v1342_v15 = vadd.f32 %v1341_v30, %v1327_v14  ;;  %v1617_v14 = vld [vmem:[#allocation6 + $0x120] sm:$0xff]  ;;  %v1600_v30 = vld [vmem:[#allocation6 + $0x98] sm:$0xff]  ;;  %2560 = vmatpush3.msra.mxu0 %v1585_v29 }
 0x230   : > { %2595 = vmatpush3.msra.mxu1 %v1617_v14  ;;  %2561 = vmatprep.subr.mxu0 %v1600_v30  ;;  %v1492_v14 = vrot.slane %v3289_v63, %v3144_v28 }
 0x231   : > { %v1343_v35 = vadd.f32 %v1342_v15, %v1328_v33  ;;  %v1632_v33 = vld [vmem:[#allocation6 + $0x198] sm:$0xff] }
 0x232   : > { %v1584_v15 = vld [vmem:[#allocation6 + $0x18] sm:$0xff]  ;;  %2596 = vmatprep.subr.mxu1 %v1632_v33 }
 0x233   : > { %1344 = vadd.xlane.f32.xlu0 %v1343_v35  ;;  %v1616_v35 = vld [vmem:[#allocation6 + $0x118] sm:$0xff]  ;;  %2562 = vmatpush3.msra.mxu0 %v1584_v15 }
 0x234   : > { %2597 = vmatpush3.msra.mxu1 %v1616_v35  ;;  %2563 = vmatprep.subr.mxu0 %v1599_v36 }
 0x235   : > { %2598 = vmatprep.subr.mxu1 %v1631_v37  ;;  %2564 = vmatpush3.msra.mxu0 %v1583_v21 }
 0x236   : > { %2599 = vmatpush3.msra.mxu1 %v1615_v39  ;;  %2565 = vmatprep.subr.mxu0 %v1598_v41 }
 0x237   : > { %2600 = vmatprep.subr.mxu1 %v1630_v42  ;;  %2566 = vmatpush3.msra.mxu0 %v1582_v43 }
 0x238   : > { %2601 = vmatpush3.msra.mxu1 %v1614_v45  ;;  %2567 = vmatprep.subr.mxu0 %v1597_v46 }
 0x239   : > { %2602 = vmatprep.subr.mxu1 %v1629_v52  ;;  %2568 = vmatpush3.msra.mxu0 %v1581_v53  ;;  %v1692_v52 = vld [vmem:[#allocation6 + $0x378] sm:$0xff]  ;;  %v1675_v53 = vld [vmem:[#allocation6 + $0x2f0] sm:$0xff] }
 0x23a   : > { %2603 = vmatpush3.msra.mxu1 %v1613_v18  ;;  %2607 = vmatprep.subr.mxu0 %v1676_v1  ;;  %v1707_v1 = vld [vmem:[#allocation6 + $0x3f0] sm:$0xff] }
 0x23b   : > { %2642 = vmatprep.subr.mxu1 %v1708_v24  ;;  %v3332_v24 = vld [vmem:[%s3422_s3 + $0x8] sm:$0xff] }
 0x2bc   : > { %v1345_v58 = vpop.xlane.xlu0 %1344 }
 0x2bd   : > { %v1346_v31 = vmul.f32 0.00048828125, %v1345_v58 }
 0x2bf   : > { %v1347_v61 = vadd.f32 1e-05, %v1346_v31  ;;  %v1659_v31 = vld [vmem:[#allocation6 + $0x270] sm:$0xff] }
 0x2c1   : > { %2860 = vrsqrt.f32 %v1347_v61  ;;  %v1691_v61 = vld [vmem:[#allocation6 + $0x370] sm:$0xff] }
 0x2ce   : > { %v3303_v10 = vpop.eup %2860 }
 0x2cf   : > { %v1350_v23 = vmul.f32 %v3303_v10, %v3208_v48  ;;  %v1352_v25 = vmul.f32 %v3303_v10, %v3218_v54  ;;  %v1349_v26 = vmul.f32 %v3303_v10, %v3205_v47  ;;  %v1351_v27 = vmul.f32 %v3303_v10, %v3211_v49 }
 0x2d0   : > { %v1354_v29 = vmul.f32 %v3303_v10, %v3226_v57  ;;  %v1356_v30 = vmul.f32 %v3303_v10, %v3236_v32  ;;  %v1500_v48 = vrot.slane %v3289_v63, %v3159_v40  ;;  %v1660_v32 = vld [vmem:[#allocation6 + $0x278] sm:$0xff] }
 0x2d1   : > { %v1450_v33 = vmul.f32 %v1376_v3, %v1350_v23  ;;  %v1452_v54 = vmul.f32 %v1384_v4, %v1352_v25  ;;  %v1449_v15 = vmul.f32 %v1372_v5, %v1349_v26  ;;  %v1451_v35 = vmul.f32 %v1380_v6, %v1351_v27  ;;  %v1674_v3 = vld [vmem:[#allocation6 + $0x2e8] sm:$0xff]  ;;  %v3334_v5 = vld [vmem:[#allocation4 + $0x8] sm:$0xff]  ;;  %v1689_v23 = vld [vmem:[#allocation6 + $0x360] sm:$0xff] }
 0x2d2   : > { %v1454_v47 = vmul.f32 %v1392_v7, %v1354_v29  ;;  %v1456_v36 = vmul.f32 %v1400_v9, %v1356_v30  ;;  %v1706_v4 = vld [vmem:[#allocation6 + $0x3e8] sm:$0xff]  ;;  %v1420_v9 = vrot.slane %v3332_v24, %v3136_v22  ;;  %v1361_v25 = vmul.f32 %v3303_v10, %v3261_v56  ;;  %v1672_v27 = vld [vmem:[#allocation6 + $0x2d8] sm:$0xff]  ;;  %v1671_v56 = vld [vmem:[#allocation6 + $0x2d0] sm:$0xff] }
 0x2d3   : > { %v1550_v37 = vadd.f32 %v1476_v13, %v1450_v33  ;;  %v1552_v49 = vadd.f32 %v1484_v16, %v1452_v54  ;;  %v1549_v21 = vadd.f32 %v1472_v0, %v1449_v15  ;;  %v1551_v39 = vadd.f32 %v1480_v19, %v1451_v35  ;;  %v1658_v6 = vld [vmem:[#allocation6 + $0x268] sm:$0xff]  ;;  %v1673_v13 = vld [vmem:[#allocation6 + $0x2e0] sm:$0xff]  ;;  %v1704_v29 = vld [vmem:[#allocation6 + $0x3d8] sm:$0xff] }
 0x2d4   : > { %v1554_v57 = vadd.f32 %v1492_v14, %v1454_v47  ;;  %v1556_v41 = vadd.f32 %v1500_v48, %v1456_v36  ;;  %v1690_v7 = vld [vmem:[#allocation6 + $0x368] sm:$0xff]  ;;  %v1705_v16 = vld [vmem:[#allocation6 + $0x3e0] sm:$0xff]  ;;  %v1428_v0 = vrot.slane %v3332_v24, %v3152_v34  ;;  %v1520_v26 = vrot.slane %v3334_v5, %v3136_v22  ;;  %v1656_v48 = vld [vmem:[#allocation6 + $0x258] sm:$0xff] }
 0x2d5   : > { %v1566_v42 = vmax.f32 %v1550_v37, 0.0  ;;  %v1568_v43 = vmax.f32 %v1552_v49, 0.0  ;;  %v1565_v45 = vmax.f32 %v1549_v21, 0.0  ;;  %v1567_v46 = vmax.f32 %v1551_v39, 0.0  ;;  %v1657_v19 = vld [vmem:[#allocation6 + $0x260] sm:$0xff]  ;;  %v1688_v33 = vld [vmem:[#allocation6 + $0x358] sm:$0xff] }
 0x2d6   : > { %v1570_v18 = vmax.f32 %v1554_v57, 0.0  ;;  %v1572_v58 = vmax.f32 %v1556_v41, 0.0  ;;  %v1363_v14 = vmul.f32 %v3303_v10, %v3271_v2  ;;  %v1528_v30 = vrot.slane %v3334_v5, %v3152_v34  ;;  %v1703_v15 = vld [vmem:[#allocation6 + $0x3d0] sm:$0xff]  ;;  %v1670_v2 = vld [vmem:[#allocation6 + $0x2c8] sm:$0xff]  ;;  %v1669_v41 = vld [vmem:[#allocation6 + $0x2c0] sm:$0xff] }
 0x2d7   : > { %1908 = vmatprep.mubr.f32.mxu0 %v1566_v42  ;;  %1978 = vmatprep.mubr.f32.mxu1 %v1568_v43  ;;  %v1461_v54 = vmul.f32 %v1420_v9, %v1361_v25  ;;  %v1655_v47 = vld [vmem:[#allocation6 + $0x250] sm:$0xff]  ;;  %v1702_v49 = vld [vmem:[#allocation6 + $0x3c8] sm:$0xff]  ;;  %v1701_v42 = vld [vmem:[#allocation6 + $0x3c0] sm:$0xff]  ;;  %v1353_v9 = vmul.f32 %v3303_v10, %v3221_v55  ;;  %v1408_v55 = vrot.slane %v3332_v24, %v3120_v12 }
 0x2d8   : > { %1909 = vmatmul.mubr.f32.vlgmr.msra.gmra.mxu0 %v1565_v45  ;;  %1979 = vmatmul.mubr.f32.vlgmr.msra.gmra.mxu1 %v1567_v46  ;;  %v1463_v35 = vmul.f32 %v1428_v0, %v1363_v14  ;;  %v1687_v36 = vld [vmem:[#allocation6 + $0x350] sm:$0xff]  ;;  %v1654_v39 = vld [vmem:[#allocation6 + $0x248] sm:$0xff]  ;;  %v1653_v43 = vld [vmem:[#allocation6 + $0x240] sm:$0xff]  ;;  %v1416_v14 = vrot.slane %v3332_v24, %v3134_v20 }
 0x2d9   : > { %2608 = vmatpush3.msra.mxu0 %v1660_v32  ;;  %2643 = vmatpush3.msra.mxu1 %v1692_v52  ;;  %v3348_v37 = vadd.f32 %v1520_v26, %v1461_v54  ;;  %v1686_v57 = vld [vmem:[#allocation6 + $0x348] sm:$0xff]  ;;  %v1685_v45 = vld [vmem:[#allocation6 + $0x340] sm:$0xff]  ;;  %v1668_v46 = vld [vmem:[#allocation6 + $0x2b8] sm:$0xff]  ;;  %v1358_v26 = vmul.f32 %v3303_v10, %v3246_v44  ;;  %v1496_v54 = vrot.slane %v3289_v63, %v3152_v34 }
 0x2da   : > { %2609 = vmatprep.subr.mxu0 %v1675_v53  ;;  %2048 = vmatprep.mubr.f32.mxu0 %v1570_v18  ;;  %v3350_v21 = vadd.f32 %v1528_v30, %v1463_v35  ;;  %v1700_v32 = vld [vmem:[#allocation6 + $0x3b8] sm:$0xff]  ;;  %v1667_v18 = vld [vmem:[#allocation6 + $0x2b0] sm:$0xff]  ;;  %v1665_v0 = vld [vmem:[#allocation6 + $0x2a0] sm:$0xff] }
 0x2db   : > { %2644 = vmatprep.subr.mxu1 %v1707_v1  ;;  %2118 = vmatprep.mubr.f32.mxu1 %v1572_v58  ;;  %v1652_v52 = vld [vmem:[#allocation6 + $0x238] sm:$0xff]  ;;  %v1699_v1 = vld [vmem:[#allocation6 + $0x3b0] sm:$0xff]  ;;  %v1681_v25 = vld [vmem:[#allocation6 + $0x320] sm:$0xff]  ;;  %v1458_v35 = vmul.f32 %v1408_v55, %v1358_v26 }
 0x2dc   : > { %2610 = vmatpush3.msra.mxu0 %v1659_v31  ;;  %2645 = vmatpush3.msra.mxu1 %v1691_v61  ;;  %v1684_v53 = vld [vmem:[#allocation6 + $0x338] sm:$0xff]  ;;  %v1651_v58 = vld [vmem:[#allocation6 + $0x230] sm:$0xff]  ;;  %v1666_v61 = vld [vmem:[#allocation6 + $0x2a8] sm:$0xff] }
 0x2dd   : > { %2611 = vmatprep.subr.mxu0 %v1674_v3  ;;  %2646 = vmatprep.subr.mxu1 %v1706_v4  ;;  %v1683_v31 = vld [vmem:[#allocation6 + $0x330] sm:$0xff]  ;;  %v1698_v3 = vld [vmem:[#allocation6 + $0x3a8] sm:$0xff]  ;;  %v1388_v4 = vrot.slane %v3287_v62, %v3136_v22  ;;  %v1648_v30 = vld [vmem:[#allocation6 + $0x218] sm:$0xff] }
 0x2de   : > { %2612 = vmatpush3.msra.mxu0 %v1658_v6  ;;  %2647 = vmatpush3.msra.mxu1 %v1690_v7  ;;  %v1650_v6 = vld [vmem:[#allocation6 + $0x228] sm:$0xff]  ;;  %v1680_v44 = vld [vmem:[#allocation6 + $0x318] sm:$0xff]  ;;  %v1753_v26 = vld [vmem:[#allocation6 + $0x560] sm:$0xff] }
 0x2df   : > { %2613 = vmatprep.subr.mxu0 %v1673_v13  ;;  %2648 = vmatprep.subr.mxu1 %v1705_v16  ;;  %v1682_v7 = vld [vmem:[#allocation6 + $0x328] sm:$0xff]  ;;  %v1355_v13 = vmul.f32 %v3303_v10, %v3231_v59  ;;  %v1396_v16 = vrot.slane %v3287_v62, %v3152_v34  ;;  %v1664_v59 = vld [vmem:[#allocation6 + $0x298] sm:$0xff]  ;;  %v1488_v62 = vrot.slane %v3289_v63, %v3136_v22  ;;  %v1647_v22 = vld [vmem:[#allocation6 + $0x210] sm:$0xff] }
 0x2e0   : > { %2614 = vmatpush3.msra.mxu0 %v1657_v19  ;;  %2649 = vmatpush3.msra.mxu1 %v1689_v23  ;;  %v1697_v19 = vld [vmem:[#allocation6 + $0x3a0] sm:$0xff]  ;;  %v1516_v34 = vrot.slane %v3334_v5, %v3134_v20  ;;  %v1646_v63 = vld [vmem:[#allocation6 + $0x208] sm:$0xff]  ;;  %v1736_v55 = vld [vmem:[#allocation6 + $0x4d8] sm:$0xff] }
 0x2e1   : > { %2615 = vmatprep.subr.mxu0 %v1672_v27  ;;  %2650 = vmatprep.subr.mxu1 %v1704_v29  ;;  %v1649_v23 = vld [vmem:[#allocation6 + $0x220] sm:$0xff]  ;;  %v1696_v27 = vld [vmem:[#allocation6 + $0x398] sm:$0xff]  ;;  %v1360_v29 = vmul.f32 %v3303_v10, %v3256_v51  ;;  %v1679_v51 = vld [vmem:[#allocation6 + $0x310] sm:$0xff] }
 0x2e2   : > { %2616 = vmatpush3.msra.mxu0 %v1656_v48  ;;  %2651 = vmatpush3.msra.mxu1 %v1688_v33  ;;  %v1453_v48 = vmul.f32 %v1388_v4, %v1353_v9  ;;  %v1455_v33 = vmul.f32 %v1396_v16, %v1355_v13  ;;  %v1771_v4 = vld [vmem:[#allocation6 + $0x5f0] sm:$0xff]  ;;  %v1738_v9 = vld [vmem:[#allocation6 + $0x4e8] sm:$0xff] }
 0x2e3   : > { %2617 = vmatprep.subr.mxu0 %v1671_v56  ;;  %2652 = vmatprep.subr.mxu1 %v1703_v15  ;;  %v1663_v56 = vld [vmem:[#allocation6 + $0x290] sm:$0xff]  ;;  %v1770_v13 = vld [vmem:[#allocation6 + $0x5e8] sm:$0xff] }
 0x2e4   : > { %2618 = vmatpush3.msra.mxu0 %v1655_v47  ;;  %2653 = vmatpush3.msra.mxu1 %v1687_v36  ;;  %v1695_v15 = vld [vmem:[#allocation6 + $0x390] sm:$0xff]  ;;  %v1508_v47 = vrot.slane %v3334_v5, %v3120_v12  ;;  %v1662_v36 = vld [vmem:[#allocation6 + $0x288] sm:$0xff]  ;;  %v1645_v12 = vld [vmem:[#allocation6 + $0x200] sm:$0xff] }
 0x2e5   : > { %2619 = vmatprep.subr.mxu0 %v1670_v2  ;;  %2654 = vmatprep.subr.mxu1 %v1702_v49  ;;  %v1694_v2 = vld [vmem:[#allocation6 + $0x388] sm:$0xff]  ;;  %v1460_v49 = vmul.f32 %v1416_v14, %v1360_v29  ;;  %v1735_v29 = vld [vmem:[#allocation6 + $0x4d0] sm:$0xff] }
 0x2e6   : > { %2620 = vmatpush3.msra.mxu0 %v1654_v39  ;;  %2655 = vmatpush3.msra.mxu1 %v1686_v57  ;;  %v1678_v39 = vld [vmem:[#allocation6 + $0x308] sm:$0xff]  ;;  %v1553_v57 = vadd.f32 %v1488_v62, %v1453_v48  ;;  %v1752_v62 = vld [vmem:[#allocation6 + $0x558] sm:$0xff]  ;;  %v1767_v14 = vld [vmem:[#allocation6 + $0x5d0] sm:$0xff] }
 0x2e7   : > { %2621 = vmatprep.subr.mxu0 %v1669_v41  ;;  %2656 = vmatprep.subr.mxu1 %v1701_v42  ;;  %v1555_v41 = vadd.f32 %v1496_v54, %v1455_v33  ;;  %v1661_v42 = vld [vmem:[#allocation6 + $0x280] sm:$0xff]  ;;  %v1722_v16 = vld [vmem:[#allocation6 + $0x468] sm:$0xff] }
 0x2e8   : > { %2622 = vmatpush3.msra.mxu0 %v1653_v43  ;;  %2657 = vmatpush3.msra.mxu1 %v1685_v45  ;;  %v1693_v43 = vld [vmem:[#allocation6 + $0x380] sm:$0xff]  ;;  %v1569_v20 = vmax.f32 %v1553_v57, 0.0  ;;  %v1734_v48 = vld [vmem:[#allocation6 + $0x4c8] sm:$0xff]  ;;  %v1747_v57 = vld [vmem:[#allocation6 + $0x530] sm:$0xff] }
 0x2e9   : > { %2623 = vmatprep.subr.mxu0 %v1668_v46  ;;  %2658 = vmatprep.subr.mxu1 %v1700_v32  ;;  %v1677_v45 = vld [vmem:[#allocation6 + $0x300] sm:$0xff]  ;;  %v1558_v46 = vadd.f32 %v1508_v47, %v1458_v35  ;;  %v1560_v32 = vadd.f32 %v1516_v34, %v1460_v49  ;;  %v1766_v33 = vld [vmem:[#allocation6 + $0x5c8] sm:$0xff]  ;;  %v1732_v47 = vld [vmem:[#allocation6 + $0x4b8] sm:$0xff] }
 0x2ea   : > { %2624 = vmatpush3.msra.mxu0 %v1652_v52  ;;  %2659 = vmatpush3.msra.mxu1 %v1684_v53  ;;  %v1571_v52 = vmax.f32 %v1555_v41, 0.0  ;;  %v1740_v53 = vld [vmem:[#allocation6 + $0x4f8] sm:$0xff]  ;;  %v1718_v54 = vld [vmem:[#allocation6 + $0x448] sm:$0xff]  ;;  %v1749_v35 = vld [vmem:[#allocation6 + $0x540] sm:$0xff] }
 0x2eb   : > { %2625 = vmatprep.subr.mxu0 %v1667_v18  ;;  %2660 = vmatprep.subr.mxu1 %v1699_v1  ;;  %v1772_v18 = vld [vmem:[#allocation6 + $0x5f8] sm:$0xff]  ;;  %v1731_v34 = vld [vmem:[#allocation6 + $0x4b0] sm:$0xff]  ;;  %v1730_v41 = vld [vmem:[#allocation6 + $0x4a8] sm:$0xff] }
 0x2ec   : > { %2626 = vmatpush3.msra.mxu0 %v1651_v58  ;;  %2661 = vmatpush3.msra.mxu1 %v1683_v31  ;;  %v1724_v1 = vld [vmem:[#allocation6 + $0x478] sm:$0xff]  ;;  %v1574_v58 = vmax.f32 %v1558_v46, 0.0  ;;  %v1357_v46 = vmul.f32 %v3303_v10, %v3241_v38  ;;  %v1424_v38 = vrot.slane %v3332_v24, %v3144_v28 }
 0x2ed   : > { %2627 = vmatprep.subr.mxu0 %v1666_v61  ;;  %2662 = vmatprep.subr.mxu1 %v1698_v3  ;;  %v1756_v31 = vld [vmem:[#allocation6 + $0x578] sm:$0xff]  ;;  %v1576_v61 = vmax.f32 %v1560_v32, 0.0  ;;  %v1739_v3 = vld [vmem:[#allocation6 + $0x4f0] sm:$0xff]  ;;  %v1359_v32 = vmul.f32 %v3303_v10, %v3251_v50 }
 0x2ee   : > { %2628 = vmatpush3.msra.mxu0 %v1650_v6  ;;  %2663 = vmatpush3.msra.mxu1 %v1682_v7  ;;  %v1723_v6 = vld [vmem:[#allocation6 + $0x470] sm:$0xff]  ;;  %v1748_v49 = vld [vmem:[#allocation6 + $0x538] sm:$0xff] }
 0x2ef   : > { %2629 = vmatprep.subr.mxu0 %v1665_v0  ;;  %2664 = vmatprep.subr.mxu1 %v1697_v19  ;;  %v1755_v7 = vld [vmem:[#allocation6 + $0x570] sm:$0xff]  ;;  %v1754_v0 = vld [vmem:[#allocation6 + $0x568] sm:$0xff]  ;;  %v1737_v19 = vld [vmem:[#allocation6 + $0x4e0] sm:$0xff] }
 0x2f0   : > { %2630 = vmatpush3.msra.mxu0 %v1649_v23  ;;  %2665 = vmatpush3.msra.mxu1 %v1681_v25  ;;  %v1769_v23 = vld [vmem:[#allocation6 + $0x5e0] sm:$0xff]  ;;  %v1728_v50 = vld [vmem:[#allocation6 + $0x498] sm:$0xff] }
 0x2f1   : > { %2631 = vmatprep.subr.mxu0 %v1664_v59  ;;  %2666 = vmatprep.subr.mxu1 %v1696_v27  ;;  %v1721_v25 = vld [vmem:[#allocation6 + $0x460] sm:$0xff]  ;;  %v1768_v59 = vld [vmem:[#allocation6 + $0x5d8] sm:$0xff] }
 0x2f2   : > { %2632 = vmatpush3.msra.mxu0 %v1648_v30  ;;  %2667 = vmatpush3.msra.mxu1 %v1680_v44  ;;  %v1720_v27 = vld [vmem:[#allocation6 + $0x458] sm:$0xff]  ;;  %v1719_v30 = vld [vmem:[#allocation6 + $0x450] sm:$0xff] }
 0x2f3   : > { %2633 = vmatprep.subr.mxu0 %v1663_v56  ;;  %2668 = vmatprep.subr.mxu1 %v1695_v15  ;;  %v1751_v44 = vld [vmem:[#allocation6 + $0x550] sm:$0xff]  ;;  %v1750_v56 = vld [vmem:[#allocation6 + $0x548] sm:$0xff]  ;;  %v1733_v15 = vld [vmem:[#allocation6 + $0x4c0] sm:$0xff] }
 0x2f4   : > { %2634 = vmatpush3.msra.mxu0 %v1647_v22  ;;  %2669 = vmatpush3.msra.mxu1 %v1679_v51  ;;  %v1765_v22 = vld [vmem:[#allocation6 + $0x5c0] sm:$0xff] }
 0x2f5   : > { %2635 = vmatprep.subr.mxu0 %v1662_v36  ;;  %2670 = vmatprep.subr.mxu1 %v1694_v2  ;;  %v1717_v51 = vld [vmem:[#allocation6 + $0x440] sm:$0xff]  ;;  %v1764_v36 = vld [vmem:[#allocation6 + $0x5b8] sm:$0xff] }
 0x2f6   : > { %2636 = vmatpush3.msra.mxu0 %v1646_v63  ;;  %2671 = vmatpush3.msra.mxu1 %v1678_v39  ;;  %v1716_v2 = vld [vmem:[#allocation6 + $0x438] sm:$0xff]  ;;  %v1763_v63 = vld [vmem:[#allocation6 + $0x5b0] sm:$0xff] }
 0x2f7   : > { %2637 = vmatprep.subr.mxu0 %v1661_v42  ;;  %2672 = vmatprep.subr.mxu1 %v1693_v43  ;;  %v1715_v39 = vld [vmem:[#allocation6 + $0x430] sm:$0xff]  ;;  %v1762_v42 = vld [vmem:[#allocation6 + $0x5a8] sm:$0xff]  ;;  %v1404_v43 = vrot.slane %v3332_v24, %v3118_v11 }
 0x2f8   : > { %2638 = vmatpush3.msra.mxu0 %v1645_v12  ;;  %2673 = vmatpush3.msra.mxu1 %v1677_v45  ;;  %v1714_v12 = vld [vmem:[#allocation6 + $0x428] sm:$0xff] }
 0x2f9   : > { %2049 = vmatmul.mubr.f32.vlgmr.msra.gmra.mxu0 %v1569_v20  ;;  %2119 = vmatmul.mubr.f32.vlgmr.msra.gmra.mxu1 %v1571_v52  ;;  %v1746_v45 = vld [vmem:[#allocation6 + $0x528] sm:$0xff]  ;;  %v1412_v20 = vrot.slane %v3332_v24, %v3127_v17  ;;  %v1729_v52 = vld [vmem:[#allocation6 + $0x4a0] sm:$0xff] }
 0x2fa   : > { %2677 = vmatprep.subr.mxu0 %v1740_v53  ;;  %2712 = vmatprep.subr.mxu1 %v1772_v18  ;;  %v1761_v53 = vld [vmem:[#allocation6 + $0x5a0] sm:$0xff] }
 0x2fb   : > { %2678 = vmatpush3.msra.mxu0 %v1724_v1  ;;  %2188 = vmatprep.mubr.f32.mxu0 %v1574_v58  ;;  %v1713_v18 = vld [vmem:[#allocation6 + $0x420] sm:$0xff]  ;;  %v1362_v58 = vmul.f32 %v3303_v10, %v3266_v60  ;;  %v1744_v60 = vld [vmem:[#allocation6 + $0x518] sm:$0xff] }
 0x2fc   : > { %2713 = vmatpush3.msra.mxu1 %v1756_v31  ;;  %2258 = vmatprep.mubr.f32.mxu1 %v1576_v61  ;;  %v1745_v1 = vld [vmem:[#allocation6 + $0x520] sm:$0xff]  ;;  %v1760_v31 = vld [vmem:[#allocation6 + $0x598] sm:$0xff]  ;;  %v1504_v61 = vrot.slane %v3334_v5, %v3118_v11  ;;  %v1711_v11 = vld [vmem:[#allocation6 + $0x410] sm:$0xff] }
 0x2fd   : > { %2679 = vmatprep.subr.mxu0 %v1739_v3  ;;  %2714 = vmatprep.subr.mxu1 %v1771_v4  ;;  %v1364_v3 = vmul.f32 %v3303_v10, %v3276_v8  ;;  %v1432_v4 = vrot.slane %v3332_v24, %v3159_v40  ;;  %v1743_v8 = vld [vmem:[#allocation6 + $0x510] sm:$0xff]  ;;  %v1462_v10 = vmul.f32 %v1424_v38, %v1362_v58  ;;  %v1782_v58 = vld [vmem:[#allocation6 + $0x648] sm:$0xff] }
 0x2fe   : > { %2680 = vmatpush3.msra.mxu0 %v1723_v6  ;;  %2715 = vmatpush3.msra.mxu1 %v1755_v7  ;;  %v1712_v6 = vld [vmem:[#allocation6 + $0x418] sm:$0xff]  ;;  %v1457_v7 = vmul.f32 %v1404_v43, %v1357_v46  ;;  %v1524_v24 = vrot.slane %v3334_v5, %v3144_v28  ;;  %v1709_v28 = vld [vmem:[#allocation6 + $0x400] sm:$0xff]  ;;  %v1814_v38 = vld [vmem:[#allocation6 + $0x748] sm:$0xff] }
 0x2ff   : > { %2681 = vmatprep.subr.mxu0 %v1738_v9  ;;  %2716 = vmatprep.subr.mxu1 %v1770_v13  ;;  %v1459_v9 = vmul.f32 %v1412_v20, %v1359_v32  ;;  %v1512_v13 = vrot.slane %v3334_v5, %v3127_v17  ;;  %v1532_v17 = vrot.slane %v3334_v5, %v3159_v40  ;;  %v1800_v43 = vld [vmem:[#allocation6 + $0x6d8] sm:$0xff]  ;;  %v1799_v32 = vld [vmem:[#allocation6 + $0x6d0] sm:$0xff] }
 0x300   : > { %2682 = vmatpush3.msra.mxu0 %v1722_v16  ;;  %2717 = vmatpush3.msra.mxu1 %v1754_v0  ;;  %v1727_v16 = vld [vmem:[#allocation6 + $0x490] sm:$0xff]  ;;  %v1816_v46 = vld [vmem:[#allocation6 + $0x758] sm:$0xff] }
 0x301   : > { %2683 = vmatprep.subr.mxu0 %v1737_v19  ;;  %2718 = vmatprep.subr.mxu1 %v1769_v23  ;;  %v1759_v0 = vld [vmem:[#allocation6 + $0x590] sm:$0xff]  ;;  %v1726_v19 = vld [vmem:[#allocation6 + $0x488] sm:$0xff] }
 0x302   : > { %2684 = vmatpush3.msra.mxu0 %v1721_v25  ;;  %2719 = vmatpush3.msra.mxu1 %v1753_v26  ;;  %v1758_v23 = vld [vmem:[#allocation6 + $0x588] sm:$0xff]  ;;  %v1464_v25 = vmul.f32 %v1432_v4, %v1364_v3  ;;  %v1831_v20 = vld [vmem:[#allocation6 + $0x7d0] sm:$0xff]  ;;  %v1813_v3 = vld [vmem:[#allocation6 + $0x740] sm:$0xff] }
 0x303   : > { %2685 = vmatprep.subr.mxu0 %v1736_v55  ;;  %2720 = vmatprep.subr.mxu1 %v1768_v59  ;;  %v1710_v26 = vld [vmem:[#allocation6 + $0x408] sm:$0xff]  ;;  %v1557_v59 = vadd.f32 %v1504_v61, %v1457_v7  ;;  %v1781_v61 = vld [vmem:[#allocation6 + $0x640] sm:$0xff]  ;;  %v1796_v4 = vld [vmem:[#allocation6 + $0x6b8] sm:$0xff] }
 0x304   : > { %2686 = vmatpush3.msra.mxu0 %v1720_v27  ;;  %2721 = vmatpush3.msra.mxu1 %v1752_v62  ;;  %v1742_v55 = vld [vmem:[#allocation6 + $0x508] sm:$0xff]  ;;  %v1559_v27 = vadd.f32 %v1512_v13, %v1459_v9  ;;  %v1725_v62 = vld [vmem:[#allocation6 + $0x480] sm:$0xff]  ;;  %v1812_v7 = vld [vmem:[#allocation6 + $0x738] sm:$0xff] }
 0x305   : > { %2687 = vmatprep.subr.mxu0 %v1735_v29  ;;  %2722 = vmatprep.subr.mxu1 %v1767_v14  ;;  %v1757_v29 = vld [vmem:[#allocation6 + $0x580] sm:$0xff]  ;;  %v1573_v40 = vmax.f32 %v1557_v59, 0.0  ;;  %v1795_v9 = vld [vmem:[#allocation6 + $0x6b0] sm:$0xff]  ;;  %v1776_v59 = vld [vmem:[#allocation6 + $0x618] sm:$0xff] }
 0x306   : > { %2688 = vmatpush3.msra.mxu0 %v1719_v30  ;;  %2723 = vmatpush3.msra.mxu1 %v1751_v44  ;;  %v1741_v14 = vld [vmem:[#allocation6 + $0x500] sm:$0xff]  ;;  %v1562_v30 = vadd.f32 %v1524_v24, %v1462_v10  ;;  %v1564_v44 = vadd.f32 %v1532_v17, %v1464_v25  ;;  %v1575_v5 = vmax.f32 %v1559_v27, 0.0  ;;  %v1827_v13 = vld [vmem:[#allocation6 + $0x7b0] sm:$0xff]  ;;  %v1778_v10 = vld [vmem:[#allocation6 + $0x628] sm:$0xff] }
 0x307   : > { %2689 = vmatprep.subr.mxu0 %v1734_v48  ;;  %2724 = vmatprep.subr.mxu1 %v1766_v33  ;;  %v1804_v48 = vld [vmem:[#allocation6 + $0x6f8] sm:$0xff]  ;;  %v1810_v24 = vld [vmem:[#allocation6 + $0x728] sm:$0xff]  ;;  %v1777_v25 = vld [vmem:[#allocation6 + $0x620] sm:$0xff] }
 0x308   : > { %2690 = vmatpush3.msra.mxu0 %v1718_v54  ;;  %2725 = vmatpush3.msra.mxu1 %v1750_v56  ;;  %v1836_v33 = vld [vmem:[#allocation6 + $0x7f8] sm:$0xff]  ;;  %v1578_v56 = vmax.f32 %v1562_v30, 0.0  ;;  %v1809_v17 = vld [vmem:[#allocation6 + $0x720] sm:$0xff]  ;;  %v1790_v30 = vld [vmem:[#allocation6 + $0x688] sm:$0xff] }
 0x309   : > { %2691 = vmatprep.subr.mxu0 %v1733_v15  ;;  %2726 = vmatprep.subr.mxu1 %v1765_v22  ;;  %v1788_v54 = vld [vmem:[#allocation6 + $0x678] sm:$0xff]  ;;  %v1580_v22 = vmax.f32 %v1564_v44, 0.0  ;;  %v1822_v44 = vld [vmem:[#allocation6 + $0x788] sm:$0xff] }
 0x30a   : > { %2692 = vmatpush3.msra.mxu0 %v1717_v51  ;;  %2727 = vmatpush3.msra.mxu1 %v1749_v35  ;;  %v1820_v15 = vld [vmem:[#allocation6 + $0x778] sm:$0xff]  ;;  %v1803_v51 = vld [vmem:[#allocation6 + $0x6f0] sm:$0xff] }
 0x30b   : > { %2693 = vmatprep.subr.mxu0 %v1732_v47  ;;  %2728 = vmatprep.subr.mxu1 %v1764_v36  ;;  %v1835_v35 = vld [vmem:[#allocation6 + $0x7f0] sm:$0xff]  ;;  %v1808_v27 = vld [vmem:[#allocation6 + $0x718] sm:$0xff] }
 0x30c   : > { %2694 = vmatpush3.msra.mxu0 %v1716_v2  ;;  %2729 = vmatpush3.msra.mxu1 %v1748_v49  ;;  %v1787_v47 = vld [vmem:[#allocation6 + $0x670] sm:$0xff]  ;;  %v1802_v2 = vld [vmem:[#allocation6 + $0x6e8] sm:$0xff] }
 0x30d   : > { %2695 = vmatprep.subr.mxu0 %v1731_v34  ;;  %2730 = vmatprep.subr.mxu1 %v1763_v63  ;;  %v1819_v36 = vld [vmem:[#allocation6 + $0x770] sm:$0xff]  ;;  %v1834_v49 = vld [vmem:[#allocation6 + $0x7e8] sm:$0xff] }
 0x30e   : > { %2696 = vmatpush3.msra.mxu0 %v1715_v39  ;;  %2731 = vmatpush3.msra.mxu1 %v1747_v57  ;;  %v1786_v34 = vld [vmem:[#allocation6 + $0x668] sm:$0xff]  ;;  %v1801_v39 = vld [vmem:[#allocation6 + $0x6e0] sm:$0xff] }
 0x30f   : > { %2697 = vmatprep.subr.mxu0 %v1730_v41  ;;  %2732 = vmatprep.subr.mxu1 %v1762_v42  ;;  %v1818_v63 = vld [vmem:[#allocation6 + $0x768] sm:$0xff]  ;;  %v1833_v57 = vld [vmem:[#allocation6 + $0x7e0] sm:$0xff] }
 0x310   : > { %2698 = vmatpush3.msra.mxu0 %v1714_v12  ;;  %2733 = vmatpush3.msra.mxu1 %v1746_v45  ;;  %v1785_v41 = vld [vmem:[#allocation6 + $0x660] sm:$0xff]  ;;  %v1832_v12 = vld [vmem:[#allocation6 + $0x7d8] sm:$0xff] }
 0x311   : > { %2699 = vmatprep.subr.mxu0 %v1729_v52  ;;  %2734 = vmatprep.subr.mxu1 %v1761_v53  ;;  %v1817_v42 = vld [vmem:[#allocation6 + $0x760] sm:$0xff]  ;;  %v1784_v45 = vld [vmem:[#allocation6 + $0x658] sm:$0xff]  ;;  %v1783_v52 = vld [vmem:[#allocation6 + $0x650] sm:$0xff] }
 0x312   : > { %2700 = vmatpush3.msra.mxu0 %v1713_v18  ;;  %2735 = vmatpush3.msra.mxu1 %v1745_v1  ;;  %v1815_v53 = vld [vmem:[#allocation6 + $0x750] sm:$0xff]  ;;  %v1798_v18 = vld [vmem:[#allocation6 + $0x6c8] sm:$0xff] }
 0x313   : > { %2701 = vmatprep.subr.mxu0 %v1728_v50  ;;  %2736 = vmatprep.subr.mxu1 %v1760_v31  ;;  %v1830_v1 = vld [vmem:[#allocation6 + $0x7c8] sm:$0xff]  ;;  %v1797_v50 = vld [vmem:[#allocation6 + $0x6c0] sm:$0xff] }
 0x314   : > { %2702 = vmatpush3.msra.mxu0 %v1712_v6  ;;  %2737 = vmatpush3.msra.mxu1 %v1744_v60  ;;  %v1829_v31 = vld [vmem:[#allocation6 + $0x7c0] sm:$0xff]  ;;  %v1828_v6 = vld [vmem:[#allocation6 + $0x7b8] sm:$0xff] }
 0x315   : > { %2703 = vmatprep.subr.mxu0 %v1727_v16  ;;  %2738 = vmatprep.subr.mxu1 %v1759_v0  ;;  %v1780_v60 = vld [vmem:[#allocation6 + $0x638] sm:$0xff]  ;;  %v1779_v16 = vld [vmem:[#allocation6 + $0x630] sm:$0xff] }
 0x316   : > { %2704 = vmatpush3.msra.mxu0 %v1711_v11  ;;  %2739 = vmatpush3.msra.mxu1 %v1743_v8  ;;  %v1811_v0 = vld [vmem:[#allocation6 + $0x730] sm:$0xff]  ;;  %v1794_v11 = vld [vmem:[#allocation6 + $0x6a8] sm:$0xff] }
 0x317   : > { %2705 = vmatprep.subr.mxu0 %v1726_v19  ;;  %2740 = vmatprep.subr.mxu1 %v1758_v23  ;;  %v1826_v8 = vld [vmem:[#allocation6 + $0x7a8] sm:$0xff]  ;;  %v1793_v19 = vld [vmem:[#allocation6 + $0x6a0] sm:$0xff] }
 0x318   : > { %2706 = vmatpush3.msra.mxu0 %v1710_v26  ;;  %2741 = vmatpush3.msra.mxu1 %v1742_v55  ;;  %v1825_v23 = vld [vmem:[#allocation6 + $0x7a0] sm:$0xff]  ;;  %v1792_v26 = vld [vmem:[#allocation6 + $0x698] sm:$0xff] }
 0x319   : > { %2707 = vmatprep.subr.mxu0 %v1725_v62  ;;  %2742 = vmatprep.subr.mxu1 %v1757_v29  ;;  %v1824_v55 = vld [vmem:[#allocation6 + $0x798] sm:$0xff]  ;;  %v1791_v62 = vld [vmem:[#allocation6 + $0x690] sm:$0xff] }
 0x31a   : > { %2708 = vmatpush3.msra.mxu0 %v1709_v28  ;;  %2743 = vmatpush3.msra.mxu1 %v1741_v14  ;;  %v1823_v29 = vld [vmem:[#allocation6 + $0x790] sm:$0xff] }
 0x31b   : > { %2189 = vmatmul.mubr.f32.vlgmr.msra.gmra.mxu0 %v1573_v40  ;;  %2259 = vmatmul.mubr.f32.vlgmr.msra.gmra.mxu1 %v1575_v5  ;;  %v1775_v28 = vld [vmem:[#allocation6 + $0x610] sm:$0xff]  ;;  %v1774_v40 = vld [vmem:[#allocation6 + $0x608] sm:$0xff] }
 0x31c   : > { %2747 = vmatprep.subr.mxu0 %v1804_v48  ;;  %2782 = vmatprep.subr.mxu1 %v1836_v33  ;;  %v1807_v14 = vld [vmem:[#allocation6 + $0x710] sm:$0xff]  ;;  %v1806_v5 = vld [vmem:[#allocation6 + $0x708] sm:$0xff]  ;;  %v1789_v48 = vld [vmem:[#allocation6 + $0x680] sm:$0xff] }
 0x31d   : > { %2748 = vmatpush3.msra.mxu0 %v1788_v54  ;;  %2328 = vmatprep.mubr.f32.mxu0 %v1578_v56  ;;  %v1821_v33 = vld [vmem:[#allocation6 + $0x780] sm:$0xff] }
 0x31e   : > { %2783 = vmatpush3.msra.mxu1 %v1820_v15  ;;  %2398 = vmatprep.mubr.f32.mxu1 %v1580_v22  ;;  %v1773_v54 = vld [vmem:[#allocation6 + $0x600] sm:$0xff]  ;;  %v1577_v15 = vmax.f32 %v3348_v37, 0.0  ;;  %v1579_v22 = vmax.f32 %v3350_v21, 0.0 }
 0x31f   : > { %2749 = vmatprep.subr.mxu0 %v1803_v51  ;;  %2784 = vmatprep.subr.mxu1 %v1835_v35  ;;  %v1805_v56 = vld [vmem:[#allocation6 + $0x700] sm:$0xff] }
 0x320   : > { %2750 = vmatpush3.msra.mxu0 %v1787_v47  ;;  %2785 = vmatpush3.msra.mxu1 %v1819_v36 }
 0x321   : > { %2751 = vmatprep.subr.mxu0 %v1802_v2  ;;  %2786 = vmatprep.subr.mxu1 %v1834_v49  ;;  %v2532_v49 = vld [vmem:[%s3425_s6] ss:$0 sm:$0xff] }
 0x322   : > { %2752 = vmatpush3.msra.mxu0 %v1786_v34  ;;  %2787 = vmatpush3.msra.mxu1 %v1818_v63 }
 0x323   : > { %2753 = vmatprep.subr.mxu0 %v1801_v39  ;;  %2788 = vmatprep.subr.mxu1 %v1833_v57 }
 0x324   : > { %2754 = vmatpush3.msra.mxu0 %v1785_v41  ;;  %2789 = vmatpush3.msra.mxu1 %v1817_v42 }
 0x325   : > { %2755 = vmatprep.subr.mxu0 %v1800_v43  ;;  %2790 = vmatprep.subr.mxu1 %v1832_v12 }
 0x326   : > { %2756 = vmatpush3.msra.mxu0 %v1784_v45  ;;  %2791 = vmatpush3.msra.mxu1 %v1816_v46 }
 0x327   : > { %2757 = vmatprep.subr.mxu0 %v1799_v32  ;;  %2792 = vmatprep.subr.mxu1 %v1831_v20 }
 0x328   : > { %2758 = vmatpush3.msra.mxu0 %v1783_v52  ;;  %2793 = vmatpush3.msra.mxu1 %v1815_v53 }
 0x329   : > { %2759 = vmatprep.subr.mxu0 %v1798_v18  ;;  %2794 = vmatprep.subr.mxu1 %v1830_v1 }
 0x32a   : > { %2760 = vmatpush3.msra.mxu0 %v1782_v58  ;;  %2795 = vmatpush3.msra.mxu1 %v1814_v38 }
 0x32b   : > { %2761 = vmatprep.subr.mxu0 %v1797_v50  ;;  %2796 = vmatprep.subr.mxu1 %v1829_v31 }
 0x32c   : > { %2762 = vmatpush3.msra.mxu0 %v1781_v61  ;;  %2797 = vmatpush3.msra.mxu1 %v1813_v3 }
 0x32d   : > { %2763 = vmatprep.subr.mxu0 %v1796_v4  ;;  %2798 = vmatprep.subr.mxu1 %v1828_v6 }
 0x32e   : > { %2764 = vmatpush3.msra.mxu0 %v1780_v60  ;;  %2799 = vmatpush3.msra.mxu1 %v1812_v7 }
 0x32f   : > { %2765 = vmatprep.subr.mxu0 %v1795_v9  ;;  %2800 = vmatprep.subr.mxu1 %v1827_v13 }
 0x330   : > { %2766 = vmatpush3.msra.mxu0 %v1779_v16  ;;  %2801 = vmatpush3.msra.mxu1 %v1811_v0 }
 0x331   : > { %2767 = vmatprep.subr.mxu0 %v1794_v11  ;;  %2802 = vmatprep.subr.mxu1 %v1826_v8 }
 0x332   : > { %2768 = vmatpush3.msra.mxu0 %v1778_v10  ;;  %2803 = vmatpush3.msra.mxu1 %v1810_v24 }
 0x333   : > { %2769 = vmatprep.subr.mxu0 %v1793_v19  ;;  %2804 = vmatprep.subr.mxu1 %v1825_v23 }
 0x334   : > { %2770 = vmatpush3.msra.mxu0 %v1777_v25  ;;  %2805 = vmatpush3.msra.mxu1 %v1809_v17  ;;  %v2533_v25 = vld [vmem:[%s3426_s7] ss:$0 sm:$0xff] }
 0x335   : > { %2771 = vmatprep.subr.mxu0 %v1792_v26  ;;  %2806 = vmatprep.subr.mxu1 %v1824_v55  ;;  %v2534_v26 = vld [vmem:[%s3427_s8] ss:$0 sm:$0xff] }
 0x336   : > { %2772 = vmatpush3.msra.mxu0 %v1776_v59  ;;  %2807 = vmatpush3.msra.mxu1 %v1808_v27 }
 0x337   : > { %2773 = vmatprep.subr.mxu0 %v1791_v62  ;;  %2808 = vmatprep.subr.mxu1 %v1823_v29 }
 0x338   : > { %2774 = vmatpush3.msra.mxu0 %v1775_v28  ;;  %2809 = vmatpush3.msra.mxu1 %v1807_v14 }
 0x339   : > { %2775 = vmatprep.subr.mxu0 %v1790_v30  ;;  %2810 = vmatprep.subr.mxu1 %v1822_v44 }
 0x33a   : > { %2776 = vmatpush3.msra.mxu0 %v1774_v40  ;;  %2811 = vmatpush3.msra.mxu1 %v1806_v5 }
 0x33b   : > { %2777 = vmatprep.subr.mxu0 %v1789_v48  ;;  %2812 = vmatprep.subr.mxu1 %v1821_v33 }
 0x33c   : > { %2778 = vmatpush3.msra.mxu0 %v1773_v54  ;;  %2813 = vmatpush3.msra.mxu1 %v1805_v56 }
 0x33d   : > { %2329 = vmatmul.mubr.f32.vlgmr.msra.gmra.mxu0 %v1577_v15  ;;  %2399 = vmatmul.mubr.f32.vlgmr.msra.gmra.mxu1 %v1579_v22 }
 0x398   : > { %v2569_v51 = vpop.f32.mrf.mxu0  ;;  %v2604_v47 = vpop.f32.mrf.mxu1 }
 0x39a   : > { %v2570_v35 = vpop.f32.mrf.mxu0  ;;  %v2605_v34 = vpop.f32.mrf.mxu1 }
 0x39b   : > { %v2571_v2 = vadd.f32 %v2570_v35, %v2569_v51  ;;  %v2606_v41 = vadd.f32 %v2605_v34, %v2604_v47 }
 0x39d   : > { %v1911_v39 = vadd.f32 %v2571_v2, %v2532_v49 }
 0x39f   : > { %v1981_v42 = vadd.f32 %v2606_v41, %v1911_v39 }
 0x3b9   : > { %v2639_v36 = vpop.f32.mrf.mxu0  ;;  %v2674_v57 = vpop.f32.mrf.mxu1 }
 0x3bb   : > { %v2640_v63 = vpop.f32.mrf.mxu0  ;;  %v2675_v43 = vpop.f32.mrf.mxu1 }
 0x3bc   : > { %v2641_v21 = vadd.f32 %v2640_v63, %v2639_v36  ;;  %v2676_v32 = vadd.f32 %v2675_v43, %v2674_v57 }
 0x3be   : > { %v2051_v45 = vadd.f32 %v2641_v21, %v1981_v42 }
 0x3c0   : > { %v2121_v52 = vadd.f32 %v2676_v32, %v2051_v45 }
 0x3db   : > { %v2709_v37 = vpop.f32.mrf.mxu0  ;;  %v2744_v46 = vpop.f32.mrf.mxu1 }
 0x3dd   : > { %v2710_v12 = vpop.f32.mrf.mxu0  ;;  %v2745_v53 = vpop.f32.mrf.mxu1 }
 0x3de   : > { %v2711_v20 = vadd.f32 %v2710_v12, %v2709_v37  ;;  %v2746_v38 = vadd.f32 %v2745_v53, %v2744_v46 }
 0x3e0   : > { %v2191_v18 = vadd.f32 %v2711_v20, %v2121_v52 }
 0x3e2   : > { %v2261_v61 = vadd.f32 %v2746_v38, %v2191_v18 }
 0x3fd   : > { %v2779_v1 = vpop.f32.mrf.mxu0  ;;  %v2814_v58 = vpop.f32.mrf.mxu1 }
 0x3ff   : > { %v2780_v50 = vpop.f32.mrf.mxu0  ;;  %v2815_v31 = vpop.f32.mrf.mxu1 }
 0x400   : > { %v2781_v3 = vadd.f32 %v2780_v50, %v2779_v1  ;;  %v2816_v6 = vadd.f32 %v2815_v31, %v2814_v58 }
 0x402   : > { %v2331_v4 = vadd.f32 %v2781_v3, %v2261_v61 }
 0x404   : > { %v2401_v60 = vadd.f32 %v2816_v6, %v2331_v4 }
 0x406   : > { %2404 = vadd.xlane.f32.xlu1 %v2401_v60 }
 0x48f   : > { %v2405_v7 = vpop.xlane.xlu1 %2404 }
 0x490   : > { %v2406_v9 = vmul.f32 0.015625, %v2405_v7 }
 0x492   : > { %v2407_v13 = vsub.f32 %v2401_v60, %v2406_v9  ;;  %v2411_v0 = vmul.f32 %v2406_v9, %v2406_v9 }
 0x494   : > { %v2408_v16 = vmul.f32 %v2407_v13, %v2407_v13  ;;  %v2412_v11 = vmul.f32 64.0, %v2411_v0 }
 0x496   : > { %2409 = vadd.xlane.f32.xlu1 %v2408_v16 }
 0x51f   : > { %v2410_v8 = vpop.xlane.xlu1 %2409 }
 0x520   : > { %v2413_v10 = vsub.f32 %v2410_v8, %v2412_v11 }
 0x522   : > { %v2414_v24 = vmul.f32 0.015625, %v2413_v10 }
 0x524   : > { %v2415_v19 = vadd.f32 1e-05, %v2414_v24 }
 0x526   : > { %2862 = vrsqrt.f32 %v2415_v19 }
 0x533   : > { %v2863_v23 = vpop.eup %2862 }
 0x534   : > { %v2417_v17 = vmul.f32 %v2863_v23, %v2407_v13 }
 0x536   : > { %v2425_v55 = vmul.f32 %v2533_v25, %v2417_v17 }
 0x538   : > { %v2433_v59 = vadd.f32 %v2534_v26, %v2425_v55 }
 0x53a   : > { %2434 = vst [vmem:[%s369_s14] sm:$0xff] %v2433_v59 }
 0x53b PF: > { %s21_s30 = sadd.s32 1, %s2956_s30  }
 0x53c   : > { %p18_p3 = scmp.ge.s32.totalorder %s21_s30, 4  }
 0x53e   :  { %20 = sbr.rel (!%p18_p3) target bundleno = 2 (0x2), region = 99 }
 0x543   :  { %2454 = vsyncpa [#allocation3], 1 }
 0x544   :  { %2456 = vsyncpa [#allocation3 + $0x1], 1 }
 0x545   :  { %2457 = vsyncpa [#allocation5], 1 }

</bundles_post_ra>
